<compile_context>
chip_gen: v7x
topology: tpu7x:2x2x1
jax: 0.10.0
libtpu: 0.0.40
codegen_flags: <defaults>
</compile_context>

<pallas_src>
import math

import jax
import jax.numpy as jnp
from jax import lax
from jax.experimental import pallas as pl
from jax.experimental.pallas import tpu as pltpu


def _leaky_relu(x, slope=0.1):
    return jnp.where(x >= 0, x, slope * x)


# --------------------------------------------------------------- kernel A ---
# Fused per-node-tile feature initialisation (expansion + mix_embeddings).
# Not on the critical path (<1% of one sage layer's FLOPs) — kept simple.
def _init_features_kernel(cat_ref, flt_ref,
                          w_ei_ref, b_ei_ref,
                          w_p0_ref, b_p0_ref,
                          w_p1_ref, b_p1_ref,
                          w_d_ref, b_d_ref,
                          h_ref):
    f32 = jnp.float32
    f = h_ref.shape[1]
    # [node_emb | int_emb] @ blockdiag(W_exp, W_int): one MXU pass gives both
    # the expansion path and the int-embedding path (separate bias + LeakyReLU
    # are preserved because the weight is block-diagonal).
    ei = _leaky_relu(
        jnp.dot(cat_ref[...], w_ei_ref[...], preferred_element_type=f32)
        + b_ei_ref[...])
    h = ei[:, :f]          # self.expansion(self.node_emb(nid + 1))
    r_int = ei[:, f:]      # self.emb[key] path
    # float32 feature path: Linear -> LReLU -> Linear -> LReLU
    p0 = _leaky_relu(
        jnp.dot(flt_ref[...], w_p0_ref[...], preferred_element_type=f32)
        + b_p0_ref[...])
    r_flt = _leaky_relu(
        jnp.dot(p0, w_p1_ref[...], preferred_element_type=f32)
        + b_p1_ref[...])
    # h = h + dense(stack(extra).sum(0))
    extra = r_int + r_flt
    h_ref[...] = h + _leaky_relu(
        jnp.dot(extra, w_d_ref[...], preferred_element_type=f32)
        + b_d_ref[...])


def init_features(cat_e, flt_x, params, *, tm=512):
    n = cat_e.shape[0]
    f = params["w_dense"].shape[0]
    assert n % tm == 0

    def stream(width):
        return pl.BlockSpec((tm, width), lambda m: (m, 0))

    def resident(arr):
        shp = arr.shape
        return pl.BlockSpec(shp, lambda m, _s=shp: tuple(0 for _ in _s))

    args = (cat_e, flt_x,
            params["w_ei"], params["b_ei"],
            params["w_p0"], params["b_p0"],
            params["w_p1"], params["b_p1"],
            params["w_dense"], params["b_dense"])
    in_specs = [stream(cat_e.shape[1]), stream(flt_x.shape[1])]
    in_specs += [resident(a) for a in args[2:]]

    return pl.pallas_call(
        _init_features_kernel,
        out_shape=jax.ShapeDtypeStruct((n, f), jnp.float32),
        grid=(n // tm,),
        in_specs=in_specs,
        out_specs=pl.BlockSpec((tm, f), lambda m: (m, 0)),
        compiler_params=pltpu.CompilerParams(
            dimension_semantics=("parallel",),
            vmem_limit_bytes=32 * 1024 * 1024),
    )(*args)


# --------------------------------------------------------------- kernel B ---
# One GraphSAGE block.  Grid = (node_tiles,) "parallel".
#   adj     : int8 (tm, n_pad) streamed row block, cast to bf16 in-kernel
#   h_in    : bf16 (n_pad, F) fully VMEM-resident (constant index_map -> one DMA)
#   h_self  : f32  (tm, F) streamed
#   inv_nb  : f32  (tm, 1) streamed (degree hoisted out of the kernel)
def _sage_layer_kernel(adj_ref, h_in_ref, h_self_ref, inv_nb_ref,
                       w_self_ref, w_agg_ref, b_ref, out_ref):
    f32 = jnp.float32
    # int8 -> bf16 cast is VPU work hidden under the adj DMA; matmul stays
    # bf16 x bf16 -> f32 on the MXU with the full n_pad as K.
    a = adj_ref[...].astype(jnp.bfloat16)                    # (TM, Npad)
    h_agg = jnp.dot(a, h_in_ref[...], preferred_element_type=f32)  # (TM, F)

    h_self = h_self_ref[...]                                 # (TM, F) f32
    # neighbour mean excluding self; 1/max(w-1,1) precomputed (layer-invariant)
    h_nb = (h_agg - h_self) * inv_nb_ref[...]
    # W([h_self, h_nb]) split into two matmuls (no in-kernel concat)
    z = (jnp.dot(h_self, w_self_ref[...], preferred_element_type=f32)
         + jnp.dot(h_nb, w_agg_ref[...], preferred_element_type=f32)
         + b_ref[...])
    h_new = _leaky_relu(z)
    # h_new / max(||h_new||, 1e-6)  ==  h_new * rsqrt(max(ssq, 1e-12))
    ssq = jnp.sum(h_new * h_new, axis=1, keepdims=True)
    out_ref[...] = (h_new * lax.rsqrt(jnp.maximum(ssq, 1e-12))
                    ).astype(out_ref.dtype)


def sage_layer(adj_i8, h_in_bf16, h_self, inv_nb, w_self, w_agg, b, *, tm=512):
    n_pad, f = h_self.shape
    assert n_pad % tm == 0
    assert tm % 32 == 0                      # int8 sublane packing

    flops = 2 * n_pad * n_pad * f + 4 * n_pad * f * f
    bytes_acc = (n_pad * n_pad               # int8 adjacency
                 + n_pad * f * 2             # h_in (read once, resident)
                 + n_pad * f * 4             # h_self
                 + n_pad * 4                 # inv_nb
                 + n_pad * f * 2             # bf16 output
                 + 2 * f * f * 4 + f * 4)    # weights + bias

    return pl.pallas_call(
        _sage_layer_kernel,
        out_shape=jax.ShapeDtypeStruct((n_pad, f), jnp.bfloat16),
        grid=(n_pad // tm,),
        in_specs=[
            pl.BlockSpec((tm, n_pad), lambda m: (m, 0)),   # adj row block (int8)
            pl.BlockSpec((n_pad, f), lambda m: (0, 0)),    # h_in (resident)
            pl.BlockSpec((tm, f), lambda m: (m, 0)),       # h_self
            pl.BlockSpec((tm, 1), lambda m: (m, 0)),       # inv_nb
            pl.BlockSpec((f, f), lambda m: (0, 0)),        # W_self (resident)
            pl.BlockSpec((f, f), lambda m: (0, 0)),        # W_agg  (resident)
            pl.BlockSpec((1, f), lambda m: (0, 0)),        # bias   (resident)
        ],
        out_specs=pl.BlockSpec((tm, f), lambda m: (m, 0)),
        compiler_params=pltpu.CompilerParams(
            dimension_semantics=("parallel",),
            vmem_limit_bytes=32 * 1024 * 1024),
        cost_estimate=pl.CostEstimate(flops=flops, transcendentals=n_pad,
                                      bytes_accessed=bytes_acc),
    )(adj_i8, h_in_bf16, h_self, inv_nb, w_self, w_agg, b)


# --------------------------------------------------------- parameter init ---
def make_params(key, num_nodes, feature_size, n_layers, n_items, float_dim):
    emb_dim = 2 ** int(math.log2(feature_size / 8))
    ks = jax.random.split(key, 8 + n_layers)

    def lin(k, fan_in, fan_out):
        # xavier-uniform-ish init, stored pre-transposed: [in, out]
        bound = math.sqrt(6.0 / (fan_in + fan_out))
        kw, kb = jax.random.split(k)
        w = jax.random.uniform(kw, (fan_in, fan_out), jnp.float32, -bound, bound)
        b = 0.001 * jax.random.normal(kb, (1, fan_out), jnp.float32)
        return w, b

    p = {"emb_dim": emb_dim}
    # node_emb : Embedding(num_nodes + 1, emb_dim), std = 1 / emb_dim
    p["node_emb"] = (1.0 / emb_dim) * jax.random.normal(
        ks[0], (num_nodes + 1, emb_dim), jnp.float32)
    # int-feature embedding (padding_idx = 0), mean = 1 / emb_dim
    int_tab = 1.0 / emb_dim + jax.random.normal(
        ks[1], (n_items + 1, emb_dim), jnp.float32)
    p["int_emb"] = int_tab.at[0].set(0.0)

    w_exp, b_exp = lin(ks[2], emb_dim, feature_size)        # expansion
    w_int, b_int = lin(ks[3], emb_dim, feature_size)        # emb[key] linear
    # block-diagonal stack: [node_e | int_e] @ w_ei gives both paths at once
    w_ei = jnp.zeros((2 * emb_dim, 2 * feature_size), jnp.float32)
    w_ei = w_ei.at[:emb_dim, :feature_size].set(w_exp)
    w_ei = w_ei.at[emb_dim:, feature_size:].set(w_int)
    p["w_ei"] = w_ei
    p["b_ei"] = jnp.concatenate([b_exp, b_int], axis=1)

    p["w_p0"], p["b_p0"] = lin(ks[4], float_dim, emb_dim)          # proj w0
    p["w_p1"], p["b_p1"] = lin(ks[5], emb_dim, feature_size)       # proj w1
    p["w_dense"], p["b_dense"] = lin(ks[6], feature_size, feature_size)

    p["convs"] = []
    for i in range(n_layers):
        w, b = lin(ks[7 + i], 2 * feature_size, feature_size)
        p["convs"].append({"w_self": w[:feature_size],
                           "w_agg": w[feature_size:],
                           "b": b})
    return p


# ----------------------------------------------------------- forward pass ---
def graphsage_forward(params, adj, node_ids, int_feat, float_feat, n_layers,
                      *, tile=512):
    n = adj.shape[0]
    # embedding gathers stay in XLA (data-dependent gather outside the kernels)
    node_e = params["node_emb"][node_ids + 1]      # node_emb(nid + 1)
    int_e = params["int_emb"][int_feat]            # Embedding(int64 feature)
    cat_e = jnp.concatenate([node_e, int_e], axis=1)

    # pad node count to a tile multiple; padded nodes are isolated (zero
    # adjacency rows/cols) and sliced off at the end.
    n_extra = (-n) % tile
    if n_extra:
        cat_e = jnp.pad(cat_e, ((0, n_extra), (0, 0)))
        float_feat = jnp.pad(float_feat, ((0, n_extra), (0, 0)))
        adj = jnp.pad(adj, ((0, n_extra), (0, n_extra)))

    h0 = init_features(cat_e, float_feat, params, tm=tile)

    # degree w = A @ 1 is layer-invariant -> hoist out of the per-layer kernel
    deg = jnp.sum(adj, axis=1, keepdims=True)
    inv_nb = 1.0 / jnp.maximum(deg - 1.0, 1.0)

    # int8 adjacency is exact for 0/1 edges and halves the dominant HBM stream
    # (vs bf16); the in-kernel cast back to bf16 rides under the DMA.
    adj_i8 = adj.astype(jnp.int8)

    # every nodeflow layer holds the same node set here, so each block's
    # destination 'h' (h_self) is the init feature h0; block i maps layer i
    # features (h) to layer i+1 features.  h is carried in bf16 between layers
    # (the kernels emit bf16 directly); only the final result is cast to f32.
    h = h0.astype(jnp.bfloat16)
    for i in range(n_layers):
        c = params["convs"][i]
        h = sage_layer(adj_i8, h, h0, inv_nb,
                       c["w_self"], c["w_agg"], c["b"], tm=tile)

    result = h[:n].astype(jnp.float32)
    # assert (result != result).sum() == 0   (NaN check, done by caller)
    return result


# ------------------------------------------------------------------ main ----
if __name__ == "__main__":
    NUM_NODES = 600          # ~MovieLens-100K scale is 2625; small demo size
    FEATURE_SIZE = 128       # n_dims in the reference (lane-dense)
    N_LAYERS = 3
    N_ITEMS = 18             # max value of the int64 node attribute
    FLOAT_DIM = 8            # width of the float32 node attribute
    TILE = 256               # node tile (exercises >1 grid step at demo size)

    key = jax.random.PRNGKey(0)
    kp, ki, kf = jax.random.split(key, 3)

    params = make_params(kp, NUM_NODES, FEATURE_SIZE, N_LAYERS, N_ITEMS,
                         FLOAT_DIM)

    # synthetic deterministic graph: self loop + 2 ring neighbours per node
    eye = jnp.eye(NUM_NODES, dtype=jnp.float32)
    adj = eye + jnp.roll(eye, 1, axis=1) + jnp.roll(eye, 2, axis=1)

    node_ids = jnp.arange(NUM_NODES, dtype=jnp.int32)
    int_feat = jax.random.randint(ki, (NUM_NODES,), 0, N_ITEMS + 1, jnp.int32)
    float_feat = jax.random.normal(kf, (NUM_NODES, FLOAT_DIM), jnp.float32)

    out = graphsage_forward(params, adj, node_ids, int_feat, float_feat,
                            N_LAYERS, tile=TILE)
    out = jax.block_until_ready(out)

    assert out.shape == (NUM_NODES, FEATURE_SIZE)
    assert bool(jnp.isfinite(out).all())
    print("KERNEL_OK")
</pallas_src>

<mosaic_0001>
module attributes {stable_mosaic.version = 11 : i64} {
  func.func @_init_features_kernel(%arg0: i32, %arg1: memref<256x32xf32, #tpu.memory_space<vmem>>, %arg2: memref<256x8xf32, #tpu.memory_space<vmem>>, %arg3: memref<32x256xf32, #tpu.memory_space<vmem>>, %arg4: memref<1x256xf32, #tpu.memory_space<vmem>>, %arg5: memref<8x16xf32, #tpu.memory_space<vmem>>, %arg6: memref<1x16xf32, #tpu.memory_space<vmem>>, %arg7: memref<16x128xf32, #tpu.memory_space<vmem>>, %arg8: memref<1x128xf32, #tpu.memory_space<vmem>>, %arg9: memref<128x128xf32, #tpu.memory_space<vmem>>, %arg10: memref<1x128xf32, #tpu.memory_space<vmem>>, %arg11: memref<256x128xf32, #tpu.memory_space<vmem>>) attributes {dimension_semantics = [#tpu.dimension_semantics<parallel>], iteration_bounds = array<i64: 3>, scalar_prefetch = 0 : i64, scratch_operands = 0 : i64, tpu.core_type = #tpu.core_type<tc>, window_params = [{transform_indices = @transform_0, window_bounds = array<i64: 256, 32>}, {transform_indices = @transform_1, window_bounds = array<i64: 256, 8>}, {pipeline_mode = #tpu.pipeline_mode<synchronous>, transform_indices = @transform_2, window_bounds = array<i64: 32, 256>}, {pipeline_mode = #tpu.pipeline_mode<synchronous>, transform_indices = @transform_3, window_bounds = array<i64: 1, 256>}, {pipeline_mode = #tpu.pipeline_mode<synchronous>, transform_indices = @transform_4, window_bounds = array<i64: 8, 16>}, {pipeline_mode = #tpu.pipeline_mode<synchronous>, transform_indices = @transform_5, window_bounds = array<i64: 1, 16>}, {pipeline_mode = #tpu.pipeline_mode<synchronous>, transform_indices = @transform_6, window_bounds = array<i64: 16, 128>}, {pipeline_mode = #tpu.pipeline_mode<synchronous>, transform_indices = @transform_7, window_bounds = array<i64: 1, 128>}, {pipeline_mode = #tpu.pipeline_mode<synchronous>, transform_indices = @transform_8, window_bounds = array<i64: 128, 128>}, {pipeline_mode = #tpu.pipeline_mode<synchronous>, transform_indices = @transform_9, window_bounds = array<i64: 1, 128>}, {transform_indices = @transform_10, window_bounds = array<i64: 256, 128>}]} {
    %c0 = arith.constant 0 : index
    %c0_0 = arith.constant 0 : index
    %0 = vector.load %arg1[%c0, %c0_0] : memref<256x32xf32, #tpu.memory_space<vmem>>, vector<256x32xf32>
    %c0_1 = arith.constant 0 : index
    %c0_2 = arith.constant 0 : index
    %1 = vector.load %arg3[%c0_1, %c0_2] : memref<32x256xf32, #tpu.memory_space<vmem>>, vector<32x256xf32>
    %cst = arith.constant dense<0.000000e+00> : vector<256x256xf32>
    %2 = tpu.matmul %0, %1, %cst {dimension_numbers = #tpu.dot_dimension_numbers<[1], [0], [0], [1], [0, 0, 1, 1], [], []>} : vector<256x32xf32>, vector<32x256xf32>, vector<256x256xf32> -> vector<256x256xf32>
    %c0_3 = arith.constant 0 : index
    %c0_4 = arith.constant 0 : index
    %3 = vector.load %arg4[%c0_3, %c0_4] : memref<1x256xf32, #tpu.memory_space<vmem>>, vector<1x256xf32>
    %4 = vector.broadcast %3 : vector<1x256xf32> to vector<256x256xf32>
    %5 = arith.addf %2, %4 : vector<256x256xf32>
    %cst_5 = arith.constant 0.000000e+00 : f32
    %6 = vector.broadcast %cst_5 : f32 to vector<256x256xf32>
    %7 = arith.cmpf oge, %5, %6 : vector<256x256xf32>
    %cst_6 = arith.constant 1.000000e-01 : f32
    %8 = vector.broadcast %cst_6 : f32 to vector<256x256xf32>
    %9 = arith.mulf %8, %5 : vector<256x256xf32>
    %10 = arith.select %7, %5, %9 : vector<256x256xi1>, vector<256x256xf32>
    %11 = vector.extract_strided_slice %10 {offsets = [0, 0], sizes = [256, 128], strides = [1, 1]} : vector<256x256xf32> to vector<256x128xf32>
    %12 = vector.extract_strided_slice %10 {offsets = [0, 128], sizes = [256, 128], strides = [1, 1]} : vector<256x256xf32> to vector<256x128xf32>
    %c0_7 = arith.constant 0 : index
    %c0_8 = arith.constant 0 : index
    %13 = vector.load %arg2[%c0_7, %c0_8] : memref<256x8xf32, #tpu.memory_space<vmem>>, vector<256x8xf32>
    %c0_9 = arith.constant 0 : index
    %c0_10 = arith.constant 0 : index
    %14 = vector.load %arg5[%c0_9, %c0_10] : memref<8x16xf32, #tpu.memory_space<vmem>>, vector<8x16xf32>
    %cst_11 = arith.constant dense<0.000000e+00> : vector<256x16xf32>
    %15 = tpu.matmul %13, %14, %cst_11 {dimension_numbers = #tpu.dot_dimension_numbers<[1], [0], [0], [1], [0, 0, 1, 1], [], []>} : vector<256x8xf32>, vector<8x16xf32>, vector<256x16xf32> -> vector<256x16xf32>
    %c0_12 = arith.constant 0 : index
    %c0_13 = arith.constant 0 : index
    %16 = vector.load %arg6[%c0_12, %c0_13] : memref<1x16xf32, #tpu.memory_space<vmem>>, vector<1x16xf32>
    %17 = vector.broadcast %16 : vector<1x16xf32> to vector<256x16xf32>
    %18 = arith.addf %15, %17 : vector<256x16xf32>
    %cst_14 = arith.constant 0.000000e+00 : f32
    %19 = vector.broadcast %cst_14 : f32 to vector<256x16xf32>
    %20 = arith.cmpf oge, %18, %19 : vector<256x16xf32>
    %cst_15 = arith.constant 1.000000e-01 : f32
    %21 = vector.broadcast %cst_15 : f32 to vector<256x16xf32>
    %22 = arith.mulf %21, %18 : vector<256x16xf32>
    %23 = arith.select %20, %18, %22 : vector<256x16xi1>, vector<256x16xf32>
    %c0_16 = arith.constant 0 : index
    %c0_17 = arith.constant 0 : index
    %24 = vector.load %arg7[%c0_16, %c0_17] : memref<16x128xf32, #tpu.memory_space<vmem>>, vector<16x128xf32>
    %cst_18 = arith.constant dense<0.000000e+00> : vector<256x128xf32>
    %25 = tpu.matmul %23, %24, %cst_18 {dimension_numbers = #tpu.dot_dimension_numbers<[1], [0], [0], [1], [0, 0, 1, 1], [], []>} : vector<256x16xf32>, vector<16x128xf32>, vector<256x128xf32> -> vector<256x128xf32>
    %c0_19 = arith.constant 0 : index
    %c0_20 = arith.constant 0 : index
    %26 = vector.load %arg8[%c0_19, %c0_20] : memref<1x128xf32, #tpu.memory_space<vmem>>, vector<1x128xf32>
    %27 = vector.broadcast %26 : vector<1x128xf32> to vector<256x128xf32>
    %28 = arith.addf %25, %27 : vector<256x128xf32>
    %cst_21 = arith.constant 0.000000e+00 : f32
    %29 = vector.broadcast %cst_21 : f32 to vector<256x128xf32>
    %30 = arith.cmpf oge, %28, %29 : vector<256x128xf32>
    %cst_22 = arith.constant 1.000000e-01 : f32
    %31 = vector.broadcast %cst_22 : f32 to vector<256x128xf32>
    %32 = arith.mulf %31, %28 : vector<256x128xf32>
    %33 = arith.select %30, %28, %32 : vector<256x128xi1>, vector<256x128xf32>
    %34 = arith.addf %12, %33 : vector<256x128xf32>
    %c0_23 = arith.constant 0 : index
    %c0_24 = arith.constant 0 : index
    %35 = vector.load %arg9[%c0_23, %c0_24] : memref<128x128xf32, #tpu.memory_space<vmem>>, vector<128x128xf32>
    %cst_25 = arith.constant dense<0.000000e+00> : vector<256x128xf32>
    %36 = tpu.matmul %34, %35, %cst_25 {dimension_numbers = #tpu.dot_dimension_numbers<[1], [0], [0], [1], [0, 0, 1, 1], [], []>} : vector<256x128xf32>, vector<128x128xf32>, vector<256x128xf32> -> vector<256x128xf32>
    %c0_26 = arith.constant 0 : index
    %c0_27 = arith.constant 0 : index
    %37 = vector.load %arg10[%c0_26, %c0_27] : memref<1x128xf32, #tpu.memory_space<vmem>>, vector<1x128xf32>
    %38 = vector.broadcast %37 : vector<1x128xf32> to vector<256x128xf32>
    %39 = arith.addf %36, %38 : vector<256x128xf32>
    %cst_28 = arith.constant 0.000000e+00 : f32
    %40 = vector.broadcast %cst_28 : f32 to vector<256x128xf32>
    %41 = arith.cmpf oge, %39, %40 : vector<256x128xf32>
    %cst_29 = arith.constant 1.000000e-01 : f32
    %42 = vector.broadcast %cst_29 : f32 to vector<256x128xf32>
    %43 = arith.mulf %42, %39 : vector<256x128xf32>
    %44 = arith.select %41, %39, %43 : vector<256x128xi1>, vector<256x128xf32>
    %45 = arith.addf %11, %44 : vector<256x128xf32>
    %c0_30 = arith.constant 0 : index
    %c0_31 = arith.constant 0 : index
    %46 = vector.load %arg11[%c0_30, %c0_31] : memref<256x128xf32, #tpu.memory_space<vmem>>, vector<256x128xf32>
    tpu.vector_store %arg11[%c0_30, %c0_31], %45 {strides = array<i32>} : memref<256x128xf32, #tpu.memory_space<vmem>>, vector<256x128xf32>,
    return
  }
  func.func @transform_0(%arg0: i32) -> (i32, i32) {
    %c0_i32 = arith.constant 0 : i32
    %c0_i32_0 = arith.constant 0 : i32
    return %arg0, %c0_i32 : i32, i32
  }
  func.func @transform_1(%arg0: i32) -> (i32, i32) {
    %c0_i32 = arith.constant 0 : i32
    %c0_i32_0 = arith.constant 0 : i32
    return %arg0, %c0_i32 : i32, i32
  }
  func.func @transform_2(%arg0: i32) -> (i32, i32) {
    %c0_i32 = arith.constant 0 : i32
    %c0_i32_0 = arith.constant 0 : i32
    %c0_i32_1 = arith.constant 0 : i32
    return %c0_i32, %c0_i32_0 : i32, i32
  }
  func.func @transform_3(%arg0: i32) -> (i32, i32) {
    %c0_i32 = arith.constant 0 : i32
    %c0_i32_0 = arith.constant 0 : i32
    %c0_i32_1 = arith.constant 0 : i32
    return %c0_i32, %c0_i32_0 : i32, i32
  }
  func.func @transform_4(%arg0: i32) -> (i32, i32) {
    %c0_i32 = arith.constant 0 : i32
    %c0_i32_0 = arith.constant 0 : i32
    %c0_i32_1 = arith.constant 0 : i32
    return %c0_i32, %c0_i32_0 : i32, i32
  }
  func.func @transform_5(%arg0: i32) -> (i32, i32) {
    %c0_i32 = arith.constant 0 : i32
    %c0_i32_0 = arith.constant 0 : i32
    %c0_i32_1 = arith.constant 0 : i32
    return %c0_i32, %c0_i32_0 : i32, i32
  }
  func.func @transform_6(%arg0: i32) -> (i32, i32) {
    %c0_i32 = arith.constant 0 : i32
    %c0_i32_0 = arith.constant 0 : i32
    %c0_i32_1 = arith.constant 0 : i32
    return %c0_i32, %c0_i32_0 : i32, i32
  }
  func.func @transform_7(%arg0: i32) -> (i32, i32) {
    %c0_i32 = arith.constant 0 : i32
    %c0_i32_0 = arith.constant 0 : i32
    %c0_i32_1 = arith.constant 0 : i32
    return %c0_i32, %c0_i32_0 : i32, i32
  }
  func.func @transform_8(%arg0: i32) -> (i32, i32) {
    %c0_i32 = arith.constant 0 : i32
    %c0_i32_0 = arith.constant 0 : i32
    %c0_i32_1 = arith.constant 0 : i32
    return %c0_i32, %c0_i32_0 : i32, i32
  }
  func.func @transform_9(%arg0: i32) -> (i32, i32) {
    %c0_i32 = arith.constant 0 : i32
    %c0_i32_0 = arith.constant 0 : i32
    %c0_i32_1 = arith.constant 0 : i32
    return %c0_i32, %c0_i32_0 : i32, i32
  }
  func.func @transform_10(%arg0: i32) -> (i32, i32) {
    %c0_i32 = arith.constant 0 : i32
    %c0_i32_0 = arith.constant 0 : i32
    return %arg0, %c0_i32 : i32, i32
  }
}

</mosaic_0001>

<bundles_post_ra>
// kernel: tpu_custom_call.1
= control target key start
LH: loop header
LB: loop body
LE: loop exit
PB: predicated region body
PF: predicated region fallthrough
CT: control target
= control target key end

     0   :  { %15 = vsyncpa [#allocation3], 0  ;;  %s4042_s0 = inlined_call_operand.vmem [shape: f32[768,32], index: 0, kind: input, shape index: {}]   ;;  %s4043_s1 = inlined_call_operand.vmem [shape: f32[768,8], index: 1, kind: input, shape index: {}]   ;;  %s4044_s2 = inlined_call_operand.vmem [shape: f32[32,256], index: 2, kind: input, shape index: {}]   ;;  %s4045_s3 = inlined_call_operand.vmem [shape: f32[1,256], index: 3, kind: input, shape index: {}]   ;;  %s4046_s4 = inlined_call_operand.vmem [shape: f32[8,16], index: 4, kind: input, shape index: {}]   ;;  %s4047_s5 = inlined_call_operand.vmem [shape: f32[1,16], index: 5, kind: input, shape index: {}]   ;;  %s4048_s6 = inlined_call_operand.vmem [shape: f32[16,128], index: 6, kind: input, shape index: {}]   ;;  %s4049_s7 = inlined_call_operand.vmem [shape: f32[1,128], index: 7, kind: input, shape index: {}]   ;;  %s4050_s8 = inlined_call_operand.vmem [shape: f32[128,128], index: 8, kind: input, shape index: {}]   ;;  %s4051_s9 = inlined_call_operand.vmem [shape: f32[1,128], index: 9, kind: input, shape index: {}]   ;;  %s4052_s10 = inlined_call_operand.hbm [shape: f32[768,128], index: 10, kind: output, shape index: {}]  }
   0x1   :  { %17 = vsyncpa [#allocation3 + $0x1], 0  ;;  %s3016_s13 = smov 0   ;;  %s3018_s14 = smov 0  }
   0x2   :  { %s3020_s15 = smov 0   ;;  %s3022_s16 = smov 0  }
   0x3 LB: > { %s3037_s17 = sadd.s32 4294967295, %s2955_s16   ;;  %s2394_s18 = sadd.s32 4294967294, %s2955_s16   ;;  %s2955_s16 = sphi %s3022_s16, %s4170_s16   ;;  %s2951_s15 = sphi %s3020_s15, %s4169_s15   ;;  %s2947_s14 = sphi %s3018_s14, %s4168_s14   ;;  %s2943_s13 = sphi %s3016_s13, %s4167_s13  }
   0x4   : > { %s3041_s19 = sadd.s32 1, %s2955_s16   ;;  %s250_s20 = sadd.s32 1, %s2951_s15 }
   0x5   : > { %s247_s21 = ssub.s32 %s2955_s16, %s3041_s19  ;;  %p260_p0 = scmp.ne.s32.totalorder %s2951_s15, %s2947_s14 }
   0x6   : > { %p248_p1 = scmp.eq.s32.totalorder %s247_s21, 0  ;;  %p261_p2 = scmp.eq.s32.totalorder %s3037_s17, 2 }
   0x7   : > { %p266_p3 = scmp.ne.s32.totalorder %s2947_s14, %s2943_s13  ;;  %p267_p4 = scmp.eq.s32.totalorder %s2394_s18, 2 }
   0x8   : > { %s3052_s22 = scalar_select %p248_p1, %s2951_s15, %s250_s20  }
   0x9   : > { %p3054_p5 = por %p261_p2, %p260_p0  ;;  %p3058_p6 = por %p267_p4, %p266_p3 }
   0xa   : > { %p2397_p7 = scmp.ge.s32.totalorder %s2955_s16, 1  ;;  %p327_p8 = scmp.lt.s32.totalorder %s2955_s16, 4 }
   0xc   : > { %p328_p9 = pnand %p2397_p7, %p327_p8 }
   0xe   : > { %331 = sbr.rel (%p328_p9) target bundleno = 895 (0x37f), region = 60 }
  0x15   : > { %v416_v0 = vld [vmem:[%s4044_s2 + $0x8] sm:$0xff]  ;;  %v418_v1 = vld [vmem:[%s4044_s2 + $0x18] sm:$0xff]  ;;  %v415_v2 = vld [vmem:[%s4044_s2] sm:$0xff]  ;;  %s2399_s11 = sshll.u32 %s3037_s17, 5  ;;  %v2957_v7 = vmov 0.0   ;;  %vm435_vm0 = vcmask 261120   ;;  %v425_v24 = vlaneseq }
  0x16   : > { %v2805_v3 = vpack.c.bf16 %v418_v1, %v416_v0  ;;  %v417_v4 = vld [vmem:[%s4044_s2 + $0x10] sm:$0xff]  ;;  %v420_v5 = vld [vmem:[%s4044_s2 + $0x28] sm:$0xff]  ;;  %v422_v6 = vld [vmem:[%s4044_s2 + $0x38] sm:$0xff]  ;;  %596 = vmatprep.mubr.f32.mxu0 %v2957_v7  ;;  %p371_p10 = scmp.lt.s32.totalorder %s2399_s11, 95  ;;  %vm1021_vm1 = vcmask 64512   ;;  %vm1448_vm4 = vcmask 130048  }
  0x17   : > { %v2807_v8 = vpack.c.bf16 %v417_v4, %v415_v2  ;;  %v2809_v9 = vpack.c.bf16 %v422_v6, %v420_v5  ;;  %v419_v10 = vld [vmem:[%s4044_s2 + $0x20] sm:$0xff]  ;;  %v421_v11 = vld [vmem:[%s4044_s2 + $0x30] sm:$0xff]  ;;  %v3135_v27 = vshrl.u32 %v425_v24, 7  ;;  %s367_s29 = sand.u32 1, %s2947_s14   ;;  %s2507_s18 = sshll.u32 %s3037_s17, 12 }
  0x18   : > { %v1013_v12 = vld [vmem:[%s4046_s4] sm:$0xff]  ;;  %2806 = vmatprep.subr.bf16.mxu0 %v2805_v3  ;;  %s4172_s11 = smov (!%p371_p10, %s2399_s11), 95  ;;  %v2811_v13 = vpack.c.bf16 %v421_v11, %v419_v10  ;;  %s2398_s30 = sshll.u32 %s367_s29, 8 }
  0x19   : > { %2849 = vmatprep.subr.mxu1 %v1013_v12  ;;  %2808 = vmatpush1.bf16.msra.mxu0 %v2807_v8  ;;  %s2400_s20 = sshll.u32 %s4172_s11, 3  ;;  %v427_v29 = vsub.s32 0, %v3135_v27  ;;  %v3146_v31 = vld [vmem:[%s4045_s3] sm:$0x3]  ;;  %s3810_s12 = scalar_lea.vmem [#allocation2], %s2398_s30 }
  0x1a   : > { %2850 = vmatpush3.msra.mxu1 %v1013_v12  ;;  %2810 = vmatprep.subr.bf16.mxu0 %v2809_v9  ;;  %s3099_s26 = scalar_lea.vmem %s4042_s0, %s2400_s20  ;;  %s3123_s28 = scalar_lea.vmem %s4043_s1, %s2400_s20 }
  0x1b   : > { %v383_v14 = vld [vmem:[%s3099_s26] sm:$0xff]  ;;  %v384_v15 = vld [vmem:[%s3099_s26 + $0x8] sm:$0xff]  ;;  %v385_v16 = vld [vmem:[%s3099_s26 + $0x10] sm:$0xff]  ;;  %v3151_v33 = vrot.slane %v3146_v31, %v427_v29  ;;  %s2320_s20 = sshll.u32 %s3810_s12, 4  ;;  %s4001_s17 = scalar_lea.sflag [#allocation3], %s367_s29  ;;  %s3995_s20 = int_to_ptr.vmem [resolvable:$true] %s2320_s20 }
  0x1c   : > { %v386_v17 = vld [vmem:[%s3099_s26 + $0x18] sm:$0xff]  ;;  %v387_v18 = vld [vmem:[%s3099_s26 + $0x20] sm:$0xff]  ;;  %v388_v19 = vld [vmem:[%s3099_s26 + $0x28] sm:$0xff]  ;;  %s2893_s11 = scalar_lea.vmem %s3995_s20, 4096  ;;  %s2958_s27 = smov [#allocation2]  }
  0x1d   : > { %2812 = vmatpush1.bf16.msra.mxu0 %v2811_v13  ;;  %v389_v20 = vld [vmem:[%s3099_s26 + $0x30] sm:$0xff]  ;;  %v996_v22 = vld [vmem:[%s3123_s28 + $0x78] sm:$0xff]  ;;  %v997_v23 = vld [vmem:[%s3123_s28 + $0x80] sm:$0xff]  ;;  %p2894_p11 = scmp.ne.s32.totalorder %s3995_s20, %s2893_s11 }
  0x1e   : > { %2623 = vmatprep.subr.mxu0 %v1013_v12  ;;  %v995_v21 = vld [vmem:[%s3123_s28 + $0x70] sm:$0xff]  ;;  %v390_v25 = vld [vmem:[%s3099_s26 + $0x38] sm:$0xff]  ;;  %v998_v26 = vld [vmem:[%s3123_s28 + $0x88] sm:$0xff] }
  0x1f   : > { %2646 = vmatprep.mubr.msk.f32.mxu1 %vm1021_vm1, %v995_v21  ;;  %v999_v28 = vld [vmem:[%s3123_s28 + $0x90] sm:$0xff]  ;;  %v391_v30 = vld [vmem:[%s3099_s26 + $0x40] sm:$0xff]  ;;  %v1000_v32 = vld [vmem:[%s3123_s28 + $0x98] sm:$0xff]  ;;  %p2895_p12 = pnand %p2894_p11, %p3054_p5 }
  0x20   : > { %2403 = vmatmul.mubr.msk.f32.vlgmr.msra.gmra.mrb[0].mxu0 %vm435_vm0, %v383_v14  ;;  %2647 = vmatmul.mubr.msk.f32.vlgmr.msra.gmra.mrb[0].mxu1 %vm1021_vm1, %v996_v22  ;;  %v1001_v34 = vld [vmem:[%s3123_s28 + $0xa0] sm:$0xff]  ;;  %v392_v35 = vld [vmem:[%s3099_s26 + $0x48] sm:$0xff]  ;;  %v1003_v37 = vld [vmem:[%s3123_s28 + $0xb0] sm:$0xff] }
  0x21   : > { %2624 = vmatpush3.msra.mxu0 %v1013_v12  ;;  %602 = vmatprep.mubr.f32.mxu0 %v2957_v7  ;;  %v1002_v36 = vld [vmem:[%s3123_s28 + $0xa8] sm:$0xff]  ;;  %v393_v38 = vld [vmem:[%s3099_s26 + $0x50] sm:$0xff]  ;;  %v1004_v39 = vld [vmem:[%s3123_s28 + $0xb8] sm:$0xff]  ;;  %p2896_p13 = pneg %p2895_p12 }
  0x22   : > { %2649 = vmatprep.mubr.msk.f32.mxu1 %vm1021_vm1, %v997_v23  ;;  %v1005_v40 = vld [vmem:[%s3123_s28 + $0xc0] sm:$0xff]  ;;  %v394_v41 = vld [vmem:[%s3099_s26 + $0x58] sm:$0xff]  ;;  %v1006_v42 = vld [vmem:[%s3123_s28 + $0xc8] sm:$0xff] }
  0x23   : > { %v1007_v43 = vld [vmem:[%s3123_s28 + $0xd0] sm:$0xff]  ;;  %v395_v44 = vld [vmem:[%s3099_s26 + $0x60] sm:$0xff]  ;;  %v1008_v45 = vld [vmem:[%s3123_s28 + $0xd8] sm:$0xff] }
  0x24   : > { %2404 = vmatmul.mubr.msk.f32.gmra.mrb[2].mxu0 %vm435_vm0, %v384_v15  ;;  %2650 = vmatmul.mubr.msk.f32.gmra.mrb[2].mxu1 %vm1021_vm1, %v998_v26  ;;  %v1009_v46 = vld [vmem:[%s3123_s28 + $0xe0] sm:$0xff]  ;;  %v396_v47 = vld [vmem:[%s3099_s26 + $0x68] sm:$0xff]  ;;  %v1011_v49 = vld [vmem:[%s3123_s28 + $0xf0] sm:$0xff] }
  0x25   : > { %608 = vmatprep.mubr.f32.mxu0 %v2957_v7  ;;  %2652 = vmatprep.mubr.msk.f32.mxu1 %vm1021_vm1, %v999_v28  ;;  %v1010_v48 = vld [vmem:[%s3123_s28 + $0xe8] sm:$0xff]  ;;  %v397_v50 = vld [vmem:[%s3099_s26 + $0x70] sm:$0xff]  ;;  %v1012_v51 = vld [vmem:[%s3123_s28 + $0xf8] sm:$0xff] }
  0x26   : > { %v398_v52 = vld [vmem:[%s3099_s26 + $0x78] sm:$0xff]  ;;  %v399_v53 = vld [vmem:[%s3099_s26 + $0x80] sm:$0xff]  ;;  %v400_v54 = vld [vmem:[%s3099_s26 + $0x88] sm:$0xff] }
  0x27   : > { %v401_v55 = vld [vmem:[%s3099_s26 + $0x90] sm:$0xff]  ;;  %v402_v56 = vld [vmem:[%s3099_s26 + $0x98] sm:$0xff]  ;;  %v403_v57 = vld [vmem:[%s3099_s26 + $0xa0] sm:$0xff] }
  0x28   : > { %2405 = vmatmul.mubr.msk.f32.gmra.mrb[4].mxu0 %vm435_vm0, %v385_v16  ;;  %2653 = vmatmul.mubr.msk.f32.gmra.mrb[4].mxu1 %vm1021_vm1, %v1000_v32  ;;  %v404_v58 = vld [vmem:[%s3099_s26 + $0xa8] sm:$0xff]  ;;  %v405_v59 = vld [vmem:[%s3099_s26 + $0xb0] sm:$0xff]  ;;  %v406_v60 = vld [vmem:[%s3099_s26 + $0xb8] sm:$0xff] }
  0x29   : > { %614 = vmatprep.mubr.f32.mxu0 %v2957_v7  ;;  %2655 = vmatprep.mubr.msk.f32.mxu1 %vm1021_vm1, %v1001_v34  ;;  %v407_v61 = vld [vmem:[%s3099_s26 + $0xc0] sm:$0xff]  ;;  %v408_v62 = vld [vmem:[%s3099_s26 + $0xc8] sm:$0xff]  ;;  %v409_v63 = vld [vmem:[%s3099_s26 + $0xd0] sm:$0xff] }
  0x2a   : > { %v410_v0 = vld [vmem:[%s3099_s26 + $0xd8] sm:$0xff]  ;;  %v411_v1 = vld [vmem:[%s3099_s26 + $0xe0] sm:$0xff]  ;;  %v412_v2 = vld [vmem:[%s3099_s26 + $0xe8] sm:$0xff] }
  0x2b   : > { %v413_v3 = vld [vmem:[%s3099_s26 + $0xf0] sm:$0xff]  ;;  %v414_v4 = vld [vmem:[%s3099_s26 + $0xf8] sm:$0xff]  ;;  %v981_v5 = vld [vmem:[%s3123_s28] sm:$0xff]  ;;  %s3993_s26 = scalar_lea.hbm %s4052_s10, %s2507_s18 }
  0x2c   : > { %2406 = vmatmul.mubr.msk.f32.gmra.mrb[6].mxu0 %vm435_vm0, %v386_v17  ;;  %2656 = vmatmul.mubr.msk.f32.gmra.mrb[6].mxu1 %vm1021_vm1, %v1002_v36  ;;  %v982_v6 = vld [vmem:[%s3123_s28 + $0x8] sm:$0xff]  ;;  %v983_v8 = vld [vmem:[%s3123_s28 + $0x10] sm:$0xff]  ;;  %v984_v9 = vld [vmem:[%s3123_s28 + $0x18] sm:$0xff] }
  0x2d   : > { %620 = vmatprep.mubr.f32.mxu0 %v2957_v7  ;;  %2658 = vmatprep.mubr.msk.f32.mxu1 %vm1021_vm1, %v1003_v37  ;;  %v985_v10 = vld [vmem:[%s3123_s28 + $0x20] sm:$0xff]  ;;  %v987_v11 = vld [vmem:[%s3123_s28 + $0x30] sm:$0xff]  ;;  %v988_v12 = vld [vmem:[%s3123_s28 + $0x38] sm:$0xff] }
  0x2e   : > { %v989_v13 = vld [vmem:[%s3123_s28 + $0x40] sm:$0xff]  ;;  %v990_v14 = vld [vmem:[%s3123_s28 + $0x48] sm:$0xff]  ;;  %v991_v15 = vld [vmem:[%s3123_s28 + $0x50] sm:$0xff] }
  0x2f   : > { %v992_v16 = vld [vmem:[%s3123_s28 + $0x58] sm:$0xff]  ;;  %v993_v17 = vld [vmem:[%s3123_s28 + $0x60] sm:$0xff] }
  0x30   : > { %2407 = vmatmul.mubr.msk.f32.gmra.mrb[8].mxu0 %vm435_vm0, %v387_v18  ;;  %2659 = vmatmul.mubr.msk.f32.gmra.mrb[8].mxu1 %vm1021_vm1, %v1004_v39  ;;  %v994_v18 = vld [vmem:[%s3123_s28 + $0x68] sm:$0xff] }
  0x31   : > { %626 = vmatprep.mubr.f32.mxu0 %v2957_v7  ;;  %2661 = vmatprep.mubr.msk.f32.mxu1 %vm1021_vm1, %v1005_v40 }
  0x34   : > { %2408 = vmatmul.mubr.msk.f32.gmra.mrb[10].mxu0 %vm435_vm0, %v388_v19  ;;  %2662 = vmatmul.mubr.msk.f32.gmra.mrb[10].mxu1 %vm1021_vm1, %v1006_v42  ;;  %v1439_v19 = vld [vmem:[%s4048_s6] sm:$0xff] }
  0x35   : > { %632 = vmatprep.mubr.f32.mxu0 %v2957_v7  ;;  %2664 = vmatprep.mubr.msk.f32.mxu1 %vm1021_vm1, %v1007_v43 }
  0x38   : > { %2409 = vmatmul.mubr.msk.f32.gmra.mrb[12].mxu0 %vm435_vm0, %v389_v20  ;;  %2665 = vmatmul.mubr.msk.f32.gmra.mrb[12].mxu1 %vm1021_vm1, %v1008_v45  ;;  %v1440_v20 = vld [vmem:[%s4048_s6 + $0x8] sm:$0xff] }
  0x39   : > { %638 = vmatprep.mubr.f32.mxu0 %v2957_v7  ;;  %2667 = vmatprep.mubr.msk.f32.mxu1 %vm1021_vm1, %v1009_v46  ;;  %v2813_v21 = vpack.c.bf16 %v1440_v20, %v1439_v19 }
  0x3b   : > { %2814 = vmatprep.subr.bf16.mxu1 %v2813_v21 }
  0x3c   : > { %2410 = vmatmul.mubr.msk.f32.gmra.mrb[14].mxu0 %vm435_vm0, %v390_v25  ;;  %2668 = vmatmul.mubr.msk.f32.gmra.mrb[14].mxu1 %vm1021_vm1, %v1010_v48 }
  0x3d   : > { %644 = vmatprep.mubr.f32.mxu0 %v2957_v7  ;;  %2670 = vmatprep.mubr.msk.f32.mxu1 %vm1021_vm1, %v1011_v49 }
  0x3e   : > { %2816 = vmatpush3.bf16.msra.mxu1 %v2813_v21 }
  0x40   : > { %2411 = vmatmul.mubr.msk.f32.gmra.mrb[16].mxu0 %vm435_vm0, %v391_v30  ;;  %2671 = vmatmul.mubr.msk.f32.gmra.mrb[16].mxu1 %vm1021_vm1, %v1012_v51 }
  0x41   : > { %650 = vmatprep.mubr.f32.mxu0 %v2957_v7 }
  0x44   : > { %2412 = vmatmul.mubr.msk.f32.gmra.mrb[18].mxu0 %vm435_vm0, %v392_v35 }
  0x45   : > { %656 = vmatprep.mubr.f32.mxu0 %v2957_v7 }
  0x48   : > { %2413 = vmatmul.mubr.msk.f32.gmra.mrb[20].mxu0 %vm435_vm0, %v393_v38 }
  0x49   : > { %662 = vmatprep.mubr.f32.mxu0 %v2957_v7 }
  0x4c   : > { %2414 = vmatmul.mubr.msk.f32.gmra.mrb[22].mxu0 %vm435_vm0, %v394_v41 }
  0x4d   : > { %668 = vmatprep.mubr.f32.mxu0 %v2957_v7 }
  0x50   : > { %2415 = vmatmul.mubr.msk.f32.gmra.mrb[24].mxu0 %vm435_vm0, %v395_v44 }
  0x51   : > { %674 = vmatprep.mubr.f32.mxu0 %v2957_v7 }
  0x54   : > { %2416 = vmatmul.mubr.msk.f32.gmra.mrb[26].mxu0 %vm435_vm0, %v396_v47 }
  0x55   : > { %680 = vmatprep.mubr.f32.mxu0 %v2957_v7 }
  0x58   : > { %2417 = vmatmul.mubr.msk.f32.gmra.mrb[28].mxu0 %vm435_vm0, %v397_v50 }
  0x59   : > { %686 = vmatprep.mubr.f32.mxu0 %v2957_v7 }
  0x5c   : > { %2418 = vmatmul.mubr.msk.f32.gmra.mrb[30].mxu0 %vm435_vm0, %v398_v52 }
  0x5d   : > { %692 = vmatprep.mubr.f32.mxu0 %v2957_v7 }
  0x60   : > { %2419 = vmatmul.mubr.msk.f32.gmra.mrb[32].mxu0 %vm435_vm0, %v399_v53 }
  0x61   : > { %698 = vmatprep.mubr.f32.mxu0 %v2957_v7 }
  0x64   : > { %2420 = vmatmul.mubr.msk.f32.gmra.mrb[34].mxu0 %vm435_vm0, %v400_v54 }
  0x65   : > { %704 = vmatprep.mubr.f32.mxu0 %v2957_v7 }
  0x68   : > { %2421 = vmatmul.mubr.msk.f32.gmra.mrb[36].mxu0 %vm435_vm0, %v401_v55 }
  0x69   : > { %710 = vmatprep.mubr.f32.mxu0 %v2957_v7 }
  0x6c   : > { %2422 = vmatmul.mubr.msk.f32.gmra.mrb[38].mxu0 %vm435_vm0, %v402_v56 }
  0x6d   : > { %716 = vmatprep.mubr.f32.mxu0 %v2957_v7 }
  0x70   : > { %2423 = vmatmul.mubr.msk.f32.gmra.mrb[40].mxu0 %vm435_vm0, %v403_v57 }
  0x71   : > { %722 = vmatprep.mubr.f32.mxu0 %v2957_v7 }
  0x74   : > { %2424 = vmatmul.mubr.msk.f32.gmra.mrb[42].mxu0 %vm435_vm0, %v404_v58 }
  0x75   : > { %728 = vmatprep.mubr.f32.mxu0 %v2957_v7 }
  0x78   : > { %2425 = vmatmul.mubr.msk.f32.gmra.mrb[44].mxu0 %vm435_vm0, %v405_v59 }
  0x79   : > { %734 = vmatprep.mubr.f32.mxu0 %v2957_v7 }
  0x7c   : > { %2426 = vmatmul.mubr.msk.f32.gmra.mrb[46].mxu0 %vm435_vm0, %v406_v60 }
  0x7d   : > { %740 = vmatprep.mubr.f32.mxu0 %v2957_v7 }
  0x80   : > { %2427 = vmatmul.mubr.msk.f32.gmra.mrb[48].mxu0 %vm435_vm0, %v407_v61 }
  0x81   : > { %746 = vmatprep.mubr.f32.mxu0 %v2957_v7 }
  0x84   : > { %2428 = vmatmul.mubr.msk.f32.gmra.mrb[50].mxu0 %vm435_vm0, %v408_v62 }
  0x85   : > { %752 = vmatprep.mubr.f32.mxu0 %v2957_v7 }
  0x88   : > { %2429 = vmatmul.mubr.msk.f32.gmra.mrb[52].mxu0 %vm435_vm0, %v409_v63 }
  0x89   : > { %758 = vmatprep.mubr.f32.mxu0 %v2957_v7 }
  0x8c   : > { %2430 = vmatmul.mubr.msk.f32.gmra.mrb[54].mxu0 %vm435_vm0, %v410_v0 }
  0x8d   : > { %764 = vmatprep.mubr.f32.mxu0 %v2957_v7 }
  0x90   : > { %2431 = vmatmul.mubr.msk.f32.gmra.mrb[56].mxu0 %vm435_vm0, %v411_v1 }
  0x91   : > { %770 = vmatprep.mubr.f32.mxu0 %v2957_v7 }
  0x94   : > { %2432 = vmatmul.mubr.msk.f32.gmra.mrb[58].mxu0 %vm435_vm0, %v412_v2 }
  0x95   : > { %776 = vmatprep.mubr.f32.mxu0 %v2957_v7 }
  0x98   : > { %2433 = vmatmul.mubr.msk.f32.gmra.mrb[60].mxu0 %vm435_vm0, %v413_v3 }
  0x99   : > { %782 = vmatprep.mubr.f32.mxu0 %v2957_v7  ;;  %v986_v7 = vld [vmem:[%s3123_s28 + $0x28] sm:$0xff]  ;;  %s2897_s28 = sshll.u32 %s2958_s27, 4  ;;  %s2898_s28 = int_to_ptr.vmem [resolvable:$false] %s2897_s28 }
  0x9a   : > { %s2899_s30 = scalar_lea.vmem %s2898_s28, 8192  ;;  %p2900_p0 = scmp.lt.s32.totalorder %s3995_s20, %s2898_s28 }
  0x9b   : > { %p2901_p1 = scmp.lt.s32.totalorder %s2899_s30, %s2893_s11 }
  0x9c   : > { %2434 = vmatmul.mubr.msk.f32.gmra.mrb[62].mxu0 %vm435_vm0, %v414_v4 }
  0x9d   : > { %2625 = vmatprep.mubr.msk.f32.mxu0 %vm1021_vm1, %v981_v5  ;;  %p2902_p2 = por %p2901_p1, %p2900_p0 }
  0x9f   : > { %p2903_p3 = pnand %p2902_p2, %p2896_p13 }
  0xa0   : > { %2626 = vmatmul.mubr.msk.f32.vlgmr.msra.gmra.mrb[64].mxu0 %vm1021_vm1, %v982_v6 }
  0xa1   : > { %2628 = vmatprep.mubr.msk.f32.mxu0 %vm1021_vm1, %v983_v8 }
  0xa4   : > { %2629 = vmatmul.mubr.msk.f32.gmra.mrb[66].mxu0 %vm1021_vm1, %v984_v9 }
  0xa5   : > { %2631 = vmatprep.mubr.msk.f32.mxu0 %vm1021_vm1, %v985_v10 }
  0xa8   : > { %2632 = vmatmul.mubr.msk.f32.gmra.mrb[68].mxu0 %vm1021_vm1, %v986_v7 }
  0xa9   : > { %2634 = vmatprep.mubr.msk.f32.mxu0 %vm1021_vm1, %v987_v11 }
  0xac   : > { %2635 = vmatmul.mubr.msk.f32.gmra.mrb[70].mxu0 %vm1021_vm1, %v988_v12 }
  0xad   : > { %2637 = vmatprep.mubr.msk.f32.mxu0 %vm1021_vm1, %v989_v13 }
  0xb0   : > { %2638 = vmatmul.mubr.msk.f32.gmra.mrb[72].mxu0 %vm1021_vm1, %v990_v14 }
  0xb1   : > { %2640 = vmatprep.mubr.msk.f32.mxu0 %vm1021_vm1, %v991_v15 }
  0xb4   : > { %2641 = vmatmul.mubr.msk.f32.gmra.mrb[74].mxu0 %vm1021_vm1, %v992_v16 }
  0xb5   : > { %2643 = vmatprep.mubr.msk.f32.mxu0 %vm1021_vm1, %v993_v17 }
  0xb8   : > { %2644 = vmatmul.mubr.msk.f32.gmra.mrb[76].mxu0 %vm1021_vm1, %v994_v18 }
  0xf3   : > { %v598_v22 = vpop.f32.mrb[0].mxu0  ;;  %v3317_v46 = vpop.f32.mrb[0].mxu1 }
  0xf4   : > { %v3283_v23 = vadd.f32 %v598_v22, %v3151_v33  ;;  %v3285_v24 = vpop.f32.mrb[1].mxu0  ;;  %v3319_v47 = vpop.f32.mrb[1].mxu1 }
  0xf6   : > { %4087 = vst [vmem:[#allocation5_spill] sm:$0xff] %v3283_v23 }
  0xf7   : > { %v604_v25 = vpop.f32.mrb[2].mxu0  ;;  %v3326_v51 = vpop.f32.mrb[2].mxu1 }
  0xf8   : > { %v3288_v26 = vadd.f32 %v604_v25, %v3151_v33  ;;  %v3290_v28 = vpop.f32.mrb[3].mxu0  ;;  %v3328_v52 = vpop.f32.mrb[3].mxu1 }
  0xfa   : > { %4088 = vst [vmem:[#allocation6_spill] sm:$0xff] %v3288_v26  ;;  %v1900_v26 = vld [vmem:[%s4050_s8 + $0x10] sm:$0xff] }
  0xfb   : > { %v610_v29 = vpop.f32.mrb[4].mxu0  ;;  %v3335_v56 = vpop.f32.mrb[4].mxu1 }
  0xfc   : > { %v3293_v30 = vadd.f32 %v610_v29, %v3151_v33  ;;  %v3295_v32 = vpop.f32.mrb[5].mxu0  ;;  %v3337_v57 = vpop.f32.mrb[5].mxu1 }
  0xfe   : > { %4089 = vst [vmem:[#allocation7_spill] sm:$0xff] %v3293_v30 }
  0xff   : > { %v616_v34 = vpop.f32.mrb[6].mxu0  ;;  %v3344_v61 = vpop.f32.mrb[6].mxu1 }
 0x100   : > { %v3298_v35 = vadd.f32 %v616_v34, %v3151_v33  ;;  %v3300_v36 = vpop.f32.mrb[7].mxu0  ;;  %v3346_v62 = vpop.f32.mrb[7].mxu1 }
 0x102   : > { %4090 = vst [vmem:[#allocation8_spill] sm:$0xff] %v3298_v35 }
 0x103   : > { %v622_v37 = vpop.f32.mrb[8].mxu0  ;;  %v3353_v2 = vpop.f32.mrb[8].mxu1 }
 0x104   : > { %v3303_v38 = vadd.f32 %v622_v37, %v3151_v33  ;;  %v3305_v39 = vpop.f32.mrb[9].mxu0  ;;  %v3355_v3 = vpop.f32.mrb[9].mxu1 }
 0x106   : > { %4091 = vst [vmem:[#allocation9_spill] sm:$0xff] %v3303_v38 }
 0x107   : > { %v628_v40 = vpop.f32.mrb[10].mxu0  ;;  %v3362_v8 = vpop.f32.mrb[10].mxu1 }
 0x108   : > { %v3308_v41 = vadd.f32 %v628_v40, %v3151_v33  ;;  %v3310_v42 = vpop.f32.mrb[11].mxu0  ;;  %v3364_v9 = vpop.f32.mrb[11].mxu1 }
 0x10a   : > { %4092 = vst [vmem:[#allocation10_spill] sm:$0xff] %v3308_v41 }
 0x10b   : > { %v634_v43 = vpop.f32.mrb[12].mxu0  ;;  %v3371_v12 = vpop.f32.mrb[12].mxu1 }
 0x10c   : > { %v3313_v44 = vadd.f32 %v634_v43, %v3151_v33  ;;  %v3315_v45 = vpop.f32.mrb[13].mxu0  ;;  %v3373_v13 = vpop.f32.mrb[13].mxu1 }
 0x10e   : > { %4093 = vst [vmem:[#allocation11_spill] sm:$0xff] %v3313_v44 }
 0x10f   : > { %v640_v48 = vpop.f32.mrb[14].mxu0  ;;  %v3380_v17 = vpop.f32.mrb[14].mxu1 }
 0x110   : > { %v3322_v49 = vadd.f32 %v640_v48, %v3151_v33  ;;  %v3324_v50 = vpop.f32.mrb[15].mxu0  ;;  %v3382_v18 = vpop.f32.mrb[15].mxu1 }
 0x112   : > { %4094 = vst [vmem:[#allocation12_spill] sm:$0xff] %v3322_v49 }
 0x113   : > { %v646_v53 = vpop.f32.mrb[16].mxu0  ;;  %v3389_v22 = vpop.f32.mrb[16].mxu1 }
 0x114   : > { %v3331_v54 = vadd.f32 %v646_v53, %v3151_v33  ;;  %v3333_v55 = vpop.f32.mrb[17].mxu0  ;;  %v3391_v25 = vpop.f32.mrb[17].mxu1 }
 0x116   : > { %4095 = vst [vmem:[#allocation13_spill] sm:$0xff] %v3331_v54 }
 0x117   : > { %v652_v58 = vpop.f32.mrb[18].mxu0 }
 0x118   : > { %v3340_v59 = vadd.f32 %v652_v58, %v3151_v33  ;;  %v3342_v60 = vpop.f32.mrb[19].mxu0  ;;  %v1898_v58 = vld [vmem:[%s4050_s8] sm:$0xff] }
 0x11a   : > { %4096 = vst [vmem:[#allocation14_spill] sm:$0xff] %v3340_v59 }
 0x11b   : > { %v658_v63 = vpop.f32.mrb[20].mxu0 }
 0x11c   : > { %v3349_v0 = vadd.f32 %v658_v63, %v3151_v33  ;;  %v3351_v1 = vpop.f32.mrb[21].mxu0  ;;  %v1899_v63 = vld [vmem:[%s4050_s8 + $0x8] sm:$0xff] }
 0x11e   : > { %4097 = vst [vmem:[#allocation15_spill] sm:$0xff] %v3349_v0 }
 0x11f   : > { %v664_v4 = vpop.f32.mrb[22].mxu0 }
 0x120   : > { %v3358_v5 = vadd.f32 %v664_v4, %v3151_v33  ;;  %v3360_v6 = vpop.f32.mrb[23].mxu0 }
 0x122   : > { %4098 = vst [vmem:[#allocation16_spill] sm:$0xff] %v3358_v5 }
 0x123   : > { %v670_v10 = vpop.f32.mrb[24].mxu0 }
 0x124   : > { %v3367_v7 = vadd.f32 %v670_v10, %v3151_v33  ;;  %v3369_v11 = vpop.f32.mrb[25].mxu0 }
 0x126   : > { %4099 = vst [vmem:[#allocation17_spill] sm:$0xff] %v3367_v7 }
 0x127   : > { %v676_v14 = vpop.f32.mrb[26].mxu0 }
 0x128   : > { %v3376_v15 = vadd.f32 %v676_v14, %v3151_v33  ;;  %v3378_v16 = vpop.f32.mrb[27].mxu0  ;;  %v3414_v14 = vpack.c.bf16 %v1899_v63, %v1898_v58 }
 0x12a   : > { %4100 = vst [vmem:[#allocation18_spill] sm:$0xff] %v3376_v15  ;;  %2818 = vmatprep.subr.bf16.mxu1 %v3414_v14 }
 0x12b   : > { %v682_v19 = vpop.f32.mrb[28].mxu0 }
 0x12c   : > { %v3385_v20 = vadd.f32 %v682_v19, %v3151_v33  ;;  %v3387_v21 = vpop.f32.mrb[29].mxu0 }
 0x12e   : > { %4101 = vst [vmem:[#allocation19_spill] sm:$0xff] %v3385_v20 }
 0x12f   : > { %v688_v29 = vpop.f32.mrb[30].mxu0 }
 0x130   : > { %v3394_v34 = vadd.f32 %v688_v29, %v3151_v33  ;;  %v3396_v37 = vpop.f32.mrb[31].mxu0 }
 0x132   : > { %4102 = vst [vmem:[#allocation20_spill] sm:$0xff] %v3394_v34 }
 0x133   : > { %v694_v40 = vpop.f32.mrb[32].mxu0 }
 0x134   : > { %v3399_v43 = vadd.f32 %v694_v40, %v3151_v33  ;;  %v3401_v48 = vpop.f32.mrb[33].mxu0 }
 0x136   : > { %4103 = vst [vmem:[#allocation21_spill] sm:$0xff] %v3399_v43 }
 0x137   : > { %v700_v53 = vpop.f32.mrb[34].mxu0 }
 0x138   : > { %v3410_v4 = vadd.f32 %v700_v53, %v3151_v33  ;;  %v3412_v10 = vpop.f32.mrb[35].mxu0 }
 0x13a   : > { %4104 = vst [vmem:[#allocation22_spill] sm:$0xff] %v3410_v4 }
 0x13b   : > { %v706_v19 = vpop.f32.mrb[36].mxu0 }
 0x13c   : > { %v3418_v29 = vadd.f32 %v706_v19, %v3151_v33  ;;  %v3420_v40 = vpop.f32.mrb[37].mxu0 }
 0x13e   : > { %4105 = vst [vmem:[#allocation23_spill] sm:$0xff] %v3418_v29 }
 0x13f   : > { %v712_v43 = vpop.f32.mrb[38].mxu0 }
 0x140   : > { %v3423_v34 = vadd.f32 %v712_v43, %v3151_v33  ;;  %v3425_v20 = vpop.f32.mrb[39].mxu0 }
 0x142   : > { %4106 = vst [vmem:[#allocation24_spill] sm:$0xff] %v3423_v34 }
 0x143   : > { %v718_v53 = vpop.f32.mrb[40].mxu0 }
 0x144   : > { %v3428_v4 = vadd.f32 %v718_v53, %v3151_v33  ;;  %v3430_v58 = vpop.f32.mrb[41].mxu0 }
 0x146   : > { %4107 = vst [vmem:[#allocation25_spill] sm:$0xff] %v3428_v4 }
 0x147   : > { %v724_v63 = vpop.f32.mrb[42].mxu0 }
 0x148   : > { %v3433_v15 = vadd.f32 %v724_v63, %v3151_v33  ;;  %v3435_v19 = vpop.f32.mrb[43].mxu0 }
 0x14a   : > { %4108 = vst [vmem:[#allocation26_spill] sm:$0xff] %v3433_v15 }
 0x14b   : > { %v730_v29 = vpop.f32.mrb[44].mxu0 }
 0x14c   : > { %v3438_v7 = vadd.f32 %v730_v29, %v3151_v33  ;;  %v3440_v43 = vpop.f32.mrb[45].mxu0 }
 0x14e   : > { %4109 = vst [vmem:[#allocation27_spill] sm:$0xff] %v3438_v7 }
 0x14f   : > { %v736_v34 = vpop.f32.mrb[46].mxu0 }
 0x150   : > { %v3443_v5 = vadd.f32 %v736_v34, %v3151_v33  ;;  %v3445_v53 = vpop.f32.mrb[47].mxu0 }
 0x152   : > { %4110 = vst [vmem:[#allocation28_spill] sm:$0xff] %v3443_v5 }
 0x153   : > { %v742_v4 = vpop.f32.mrb[48].mxu0 }
 0x154   : > { %v3448_v0 = vadd.f32 %v742_v4, %v3151_v33  ;;  %v3450_v63 = vpop.f32.mrb[49].mxu0 }
 0x155   : > { %4112 = vst [vmem:[#allocation30_spill] sm:$0xff] %v3450_v63 }
 0x156   : > { %4111 = vst [vmem:[#allocation29_spill] sm:$0xff] %v3448_v0 }
 0x157   : > { %v748_v15 = vpop.f32.mrb[50].mxu0 }
 0x158   : > { %v3453_v59 = vadd.f32 %v748_v15, %v3151_v33  ;;  %v3455_v29 = vpop.f32.mrb[51].mxu0 }
 0x159   : > { %4114 = vst [vmem:[#allocation32_spill] sm:$0xff] %v3455_v29 }
 0x15a   : > { %4113 = vst [vmem:[#allocation31_spill] sm:$0xff] %v3453_v59 }
 0x15b   : > { %v754_v7 = vpop.f32.mrb[52].mxu0 }
 0x15c   : > { %v3458_v54 = vadd.f32 %v754_v7, %v3151_v33  ;;  %v3460_v34 = vpop.f32.mrb[53].mxu0 }
 0x15d   : > { %4116 = vst [vmem:[#allocation34_spill] sm:$0xff] %v3460_v34  ;;  %v1903_v34 = vld [vmem:[%s4050_s8 + $0x28] sm:$0xff] }
 0x15e   : > { %4115 = vst [vmem:[#allocation33_spill] sm:$0xff] %v3458_v54 }
 0x15f   : > { %v760_v5 = vpop.f32.mrb[54].mxu0 }
 0x160   : > { %v3463_v49 = vadd.f32 %v760_v5, %v3151_v33  ;;  %v3465_v4 = vpop.f32.mrb[55].mxu0 }
 0x161   : > { %4118 = vst [vmem:[#allocation36_spill] sm:$0xff] %v3465_v4  ;;  %v1902_v4 = vld [vmem:[%s4050_s8 + $0x20] sm:$0xff] }
 0x162   : > { %4117 = vst [vmem:[#allocation35_spill] sm:$0xff] %v3463_v49 }
 0x163   : > { %v766_v0 = vpop.f32.mrb[56].mxu0 }
 0x164   : > { %v3468_v44 = vadd.f32 %v766_v0, %v3151_v33  ;;  %v3470_v15 = vpop.f32.mrb[57].mxu0 }
 0x165   : > { %4120 = vst [vmem:[#allocation38_spill] sm:$0xff] %v3470_v15 }
 0x166   : > { %4119 = vst [vmem:[#allocation37_spill] sm:$0xff] %v3468_v44  ;;  %v3490_v44 = vld [vmem:[%s4047_s5] ss:$0 sm:$0xff] }
 0x167   : > { %v772_v59 = vpop.f32.mrb[58].mxu0  ;;  %v1260_v63 = vadd.f32 %v3317_v46, %v3490_v44  ;;  %v1270_v46 = vadd.f32 %v3326_v51, %v3490_v44 }
 0x168   : > { %v3473_v41 = vadd.f32 %v772_v59, %v3151_v33  ;;  %v3475_v7 = vpop.f32.mrb[59].mxu0 }
 0x169   : > { %4122 = vst [vmem:[#allocation40_spill] sm:$0xff] %v3475_v7 }
 0x16a   : > { %4121 = vst [vmem:[#allocation39_spill] sm:$0xff] %v3473_v41 }
 0x16b   : > { %v778_v54 = vpop.f32.mrb[60].mxu0 }
 0x16c   : > { %v3478_v38 = vadd.f32 %v778_v54, %v3151_v33  ;;  %v3480_v5 = vpop.f32.mrb[61].mxu0 }
 0x16d   : > { %4124 = vst [vmem:[#allocation42_spill] sm:$0xff] %v3480_v5 }
 0x16e   : > { %4123 = vst [vmem:[#allocation41_spill] sm:$0xff] %v3478_v38 }
 0x16f   : > { %v784_v49 = vpop.f32.mrb[62].mxu0 }
 0x170   : > { %v3483_v35 = vadd.f32 %v784_v49, %v3151_v33  ;;  %v3485_v0 = vpop.f32.mrb[63].mxu0  ;;  %v1901_v33 = vld [vmem:[%s4050_s8 + $0x18] sm:$0xff] }
 0x171   : > { %4126 = vst [vmem:[#allocation44_spill] sm:$0xff] %v3485_v0  ;;  %v2821_v5 = vpack.c.bf16 %v1901_v33, %v1900_v26  ;;  %v2825_v33 = vpack.c.bf16 %v1903_v34, %v1902_v4 }
 0x172   : > { %4125 = vst [vmem:[#allocation43_spill] sm:$0xff] %v3483_v35 }
 0x173   : > { %v2627_v59 = vpop.f32.mrb[64].mxu0 }
 0x174   : > { %v1190_v41 = vadd.f32 %v2627_v59, %v3490_v44  ;;  %v1184_v30 = vpop.f32.mrb[65].mxu0 }
 0x175   : > { %v1185_v54 = vadd.f32 %v3490_v44, %v1184_v30 }
 0x176   : > { %v1376_v38 = vmul.f32 0.1, %v1190_v41  ;;  %vm1344_vm2 = vcmp.ge.f32.partialorder %v1190_v41, 0.0 }
 0x177   : > { %vm1343_vm3 = vcmp.ge.f32.partialorder %v1185_v54, 0.0  ;;  %v1375_v49 = vmul.f32 0.1, %v1185_v54  ;;  %v2630_v35 = vpop.f32.mrb[66].mxu0 }
 0x178   : > { %v1200_v23 = vadd.f32 %v2630_v35, %v3490_v44  ;;  %v1194_v59 = vpop.f32.mrb[67].mxu0  ;;  %v1408_v7 = vsel %vm1344_vm2, %v1190_v41, %v1376_v38 }
 0x179   : > { %v1195_v0 = vadd.f32 %v3490_v44, %v1194_v59  ;;  %v1407_v30 = vsel %vm1343_vm3, %v1185_v54, %v1375_v49  ;;  %vm1358_vm3 = vcmp.ge.f32.partialorder %v1260_v63, 0.0 }
 0x17a   : > { %v1378_v15 = vmul.f32 0.1, %v1200_v23  ;;  %2677 = vmatprep.mubr.msk.f32.mxu1 %vm1448_vm4, %v1407_v30  ;;  %vm1346_vm5 = vcmp.ge.f32.partialorder %v1200_v23, 0.0  ;;  %v1904_v30 = vld [vmem:[%s4050_s8 + $0x30] sm:$0xff] }
 0x17b   : > { %vm1345_vm6 = vcmp.ge.f32.partialorder %v1195_v0, 0.0  ;;  %v1377_v35 = vmul.f32 0.1, %v1195_v0  ;;  %v2633_v29 = vpop.f32.mrb[68].mxu0  ;;  %2678 = vmatmul.mubr.msk.f32.vlgmr.msra.gmra.mrb[18].mxu1 %vm1448_vm4, %v1408_v7 }
 0x17c   : > { %v1210_v26 = vadd.f32 %v2633_v29, %v3490_v44  ;;  %v1204_v38 = vpop.f32.mrb[69].mxu0  ;;  %2820 = vmatpush3.bf16.msra.mxu1 %v3414_v14  ;;  %v1410_v59 = vsel %vm1346_vm5, %v1200_v23, %v1378_v15  ;;  %v1905_v29 = vld [vmem:[%s4050_s8 + $0x38] sm:$0xff] }
 0x17d   : > { %v1205_v41 = vadd.f32 %v3490_v44, %v1204_v38  ;;  %v1409_v54 = vsel %vm1345_vm6, %v1195_v0, %v1377_v35  ;;  %2822 = vmatprep.subr.bf16.mxu1 %v2821_v5  ;;  %v2829_v0 = vpack.c.bf16 %v1905_v29, %v1904_v30  ;;  %vm1360_vm6 = vcmp.ge.f32.partialorder %v1270_v46, 0.0 }
 0x17e   : > { %v1380_v49 = vmul.f32 0.1, %v1210_v26  ;;  %2680 = vmatprep.mubr.msk.f32.mxu1 %vm1448_vm4, %v1409_v54  ;;  %vm1348_vm7 = vcmp.ge.f32.partialorder %v1210_v26, 0.0  ;;  %v1906_v54 = vld [vmem:[%s4050_s8 + $0x40] sm:$0xff] }
 0x17f   : > { %vm1347_vm8 = vcmp.ge.f32.partialorder %v1205_v41, 0.0  ;;  %v1379_v14 = vmul.f32 0.1, %v1205_v41  ;;  %v2636_v7 = vpop.f32.mrb[70].mxu0  ;;  %2681 = vmatmul.mubr.msk.f32.gmra.mrb[20].mxu1 %vm1448_vm4, %v1410_v59  ;;  %v1907_v59 = vld [vmem:[%s4050_s8 + $0x48] sm:$0xff] }
 0x180   : > { %v1220_v34 = vadd.f32 %v2636_v7, %v3490_v44  ;;  %v1214_v4 = vpop.f32.mrb[71].mxu0  ;;  %2824 = vmatpush3.bf16.msra.mxu1 %v2821_v5  ;;  %v1412_v38 = vsel %vm1348_vm7, %v1210_v26, %v1380_v49  ;;  %v2833_v29 = vpack.c.bf16 %v1907_v59, %v1906_v54 }
 0x181   : > { %v1215_v23 = vadd.f32 %v3490_v44, %v1214_v4  ;;  %v1411_v15 = vsel %vm1347_vm8, %v1205_v41, %v1379_v14  ;;  %2826 = vmatprep.subr.bf16.mxu1 %v2825_v33 }
 0x182   : > { %v1382_v35 = vmul.f32 0.1, %v1220_v34  ;;  %2683 = vmatprep.mubr.msk.f32.mxu1 %vm1448_vm4, %v1411_v15  ;;  %vm1350_vm9 = vcmp.ge.f32.partialorder %v1220_v34, 0.0  ;;  %v1908_v15 = vld [vmem:[%s4050_s8 + $0x50] sm:$0xff] }
 0x183   : > { %vm1349_vm10 = vcmp.ge.f32.partialorder %v1215_v23, 0.0  ;;  %v1381_v5 = vmul.f32 0.1, %v1215_v23  ;;  %v2639_v7 = vpop.f32.mrb[72].mxu0  ;;  %2684 = vmatmul.mubr.msk.f32.gmra.mrb[22].mxu1 %vm1448_vm4, %v1412_v38  ;;  %v1909_v38 = vld [vmem:[%s4050_s8 + $0x58] sm:$0xff] }
 0x184   : > { %v1230_v41 = vadd.f32 %v2639_v7, %v3490_v44  ;;  %v1224_v30 = vpop.f32.mrb[73].mxu0  ;;  %2828 = vmatpush3.bf16.msra.mxu1 %v2825_v33  ;;  %v1414_v4 = vsel %vm1350_vm9, %v1220_v34, %v1382_v35  ;;  %v1255_v34 = vadd.f32 %v3490_v44, %v3319_v47 }
 0x185   : > { %v1225_v26 = vadd.f32 %v3490_v44, %v1224_v30  ;;  %v1413_v49 = vsel %vm1349_vm10, %v1215_v23, %v1381_v5  ;;  %2830 = vmatprep.subr.bf16.mxu1 %v2829_v0  ;;  %v2837_v5 = vpack.c.bf16 %v1909_v38, %v1908_v15 }
 0x186   : > { %v1384_v14 = vmul.f32 0.1, %v1230_v41  ;;  %2686 = vmatprep.mubr.msk.f32.mxu1 %vm1448_vm4, %v1413_v49  ;;  %vm1352_vm11 = vcmp.ge.f32.partialorder %v1230_v41, 0.0  ;;  %v1389_v38 = vmul.f32 0.1, %v1255_v34  ;;  %vm1357_vm15 = vcmp.ge.f32.partialorder %v1255_v34, 0.0 }
 0x187   : > { %vm1351_vm12 = vcmp.ge.f32.partialorder %v1225_v26, 0.0  ;;  %v1383_v33 = vmul.f32 0.1, %v1225_v26  ;;  %v2642_v7 = vpop.f32.mrb[74].mxu0  ;;  %2687 = vmatmul.mubr.msk.f32.gmra.mrb[24].mxu1 %vm1448_vm4, %v1414_v4  ;;  %v1910_v4 = vld [vmem:[%s4050_s8 + $0x60] sm:$0xff] }
 0x188   : > { %v1240_v23 = vadd.f32 %v2642_v7, %v3490_v44  ;;  %v1234_v54 = vpop.f32.mrb[75].mxu0  ;;  %2832 = vmatpush3.bf16.msra.mxu1 %v2829_v0  ;;  %v1416_v49 = vsel %vm1352_vm11, %v1230_v41, %v1384_v14  ;;  %v1911_v7 = vld [vmem:[%s4050_s8 + $0x68] sm:$0xff] }
 0x189   : > { %v1235_v35 = vadd.f32 %v3490_v44, %v1234_v54  ;;  %v1415_v59 = vsel %vm1351_vm12, %v1225_v26, %v1383_v33  ;;  %2834 = vmatprep.subr.bf16.mxu1 %v2833_v29  ;;  %v1265_v33 = vadd.f32 %v3490_v44, %v3328_v52  ;;  %v2841_v54 = vpack.c.bf16 %v1911_v7, %v1910_v4 }
 0x18a   : > { %v1386_v30 = vmul.f32 0.1, %v1240_v23  ;;  %2689 = vmatprep.mubr.msk.f32.mxu1 %vm1448_vm4, %v1415_v59  ;;  %vm1354_vm13 = vcmp.ge.f32.partialorder %v1240_v23, 0.0  ;;  %v1421_v52 = vsel %vm1357_vm15, %v1255_v34, %v1389_v38  ;;  %v1275_v4 = vadd.f32 %v3490_v44, %v3337_v57 }
 0x18b   : > { %vm1353_vm14 = vcmp.ge.f32.partialorder %v1235_v35, 0.0  ;;  %v1385_v47 = vmul.f32 0.1, %v1235_v35  ;;  %v2645_v0 = vpop.f32.mrb[76].mxu0  ;;  %2690 = vmatmul.mubr.msk.f32.gmra.mrb[26].mxu1 %vm1448_vm4, %v1416_v49  ;;  %v1390_v7 = vmul.f32 0.1, %v1260_v63  ;;  %v1285_v57 = vadd.f32 %v3490_v44, %v3346_v62 }
 0x18c   : > { %v1250_v26 = vadd.f32 %v2645_v0, %v3490_v44  ;;  %v1244_v15 = vpop.f32.mrb[77].mxu0  ;;  %2836 = vmatpush3.bf16.msra.mxu1 %v2833_v29  ;;  %v1418_v49 = vsel %vm1354_vm13, %v1240_v23, %v1386_v30  ;;  %vm1359_vm2 = vcmp.ge.f32.partialorder %v1265_v33, 0.0  ;;  %v1392_v30 = vmul.f32 0.1, %v1270_v46 }
 0x18d   : > { %v1245_v41 = vadd.f32 %v3490_v44, %v1244_v15  ;;  %v1417_v14 = vsel %vm1353_vm14, %v1235_v35, %v1385_v47  ;;  %2838 = vmatprep.subr.bf16.mxu1 %v2837_v5  ;;  %v1391_v35 = vmul.f32 0.1, %v1265_v33  ;;  %v1280_v0 = vadd.f32 %v3335_v56, %v3490_v44 }
 0x18e   : > { %v1388_v59 = vmul.f32 0.1, %v1250_v26  ;;  %2692 = vmatprep.mubr.msk.f32.mxu1 %vm1448_vm4, %v1417_v14  ;;  %vm1356_vm0 = vcmp.ge.f32.partialorder %v1250_v26, 0.0  ;;  %vm1361_vm5 = vcmp.ge.f32.partialorder %v1275_v4, 0.0  ;;  %v1422_v51 = vsel %vm1358_vm3, %v1260_v63, %v1390_v7 }
 0x18f   : > { %vm1355_vm1 = vcmp.ge.f32.partialorder %v1245_v41, 0.0  ;;  %v1387_v29 = vmul.f32 0.1, %v1245_v41  ;;  %2693 = vmatmul.mubr.msk.f32.gmra.mrb[28].mxu1 %vm1448_vm4, %v1418_v49  ;;  %v1423_v34 = vsel %vm1359_vm2, %v1265_v33, %v1391_v35  ;;  %v1295_v38 = vadd.f32 %v3490_v44, %v3355_v3 }
 0x190   : > { %2840 = vmatpush3.bf16.msra.mxu1 %v2837_v5  ;;  %v1420_v23 = vsel %vm1356_vm0, %v1250_v26, %v1388_v59  ;;  %v1393_v5 = vmul.f32 0.1, %v1275_v4  ;;  %v1395_v26 = vmul.f32 0.1, %v1285_v57  ;;  %v1290_v62 = vadd.f32 %v3344_v61, %v3490_v44 }
 0x191   : > { %v1419_v47 = vsel %vm1355_vm1, %v1245_v41, %v1387_v29  ;;  %2842 = vmatprep.subr.bf16.mxu1 %v2841_v54  ;;  %v1394_v41 = vmul.f32 0.1, %v1280_v0  ;;  %vm1363_vm7 = vcmp.ge.f32.partialorder %v1285_v57, 0.0  ;;  %v1424_v14 = vsel %vm1360_vm6, %v1270_v46, %v1392_v30 }
 0x192   : > { %2695 = vmatprep.mubr.msk.f32.mxu1 %vm1448_vm4, %v1419_v47  ;;  %v1425_v15 = vsel %vm1361_vm5, %v1275_v4, %v1393_v5  ;;  %vm1362_vm8 = vcmp.ge.f32.partialorder %v1280_v0, 0.0  ;;  %v1397_v56 = vmul.f32 0.1, %v1295_v38  ;;  %v1427_v63 = vsel %vm1363_vm7, %v1285_v57, %v1395_v26 }
 0x193   : > { %2696 = vmatmul.mubr.msk.f32.gmra.mrb[30].mxu1 %vm1448_vm4, %v1420_v23  ;;  %v1305_v33 = vadd.f32 %v3490_v44, %v3364_v9  ;;  %v1300_v3 = vadd.f32 %v3353_v2, %v3490_v44  ;;  %vm1365_vm9 = vcmp.ge.f32.partialorder %v1295_v38, 0.0  ;;  %v1426_v59 = vsel %vm1362_vm8, %v1280_v0, %v1394_v41 }
 0x194   : > { %2698 = vmatprep.mubr.msk.f32.mxu1 %vm1448_vm4, %v1421_v52  ;;  %2844 = vmatpush3.bf16.msra.mxu1 %v2841_v54  ;;  %v1396_v54 = vmul.f32 0.1, %v1290_v62  ;;  %vm1364_vm10 = vcmp.ge.f32.partialorder %v1290_v62, 0.0  ;;  %v1429_v49 = vsel %vm1365_vm9, %v1295_v38, %v1397_v56  ;;  %v1315_v29 = vadd.f32 %v3490_v44, %v3373_v13 }
 0x195   : > { %v1399_v61 = vmul.f32 0.1, %v1305_v33  ;;  %v1398_v35 = vmul.f32 0.1, %v1300_v3  ;;  %v1310_v9 = vadd.f32 %v3362_v8, %v3490_v44  ;;  %vm1367_vm11 = vcmp.ge.f32.partialorder %v1305_v33, 0.0 }
 0x196   : > { %v1428_v47 = vsel %vm1364_vm10, %v1290_v62, %v1396_v54  ;;  %vm1366_vm12 = vcmp.ge.f32.partialorder %v1300_v3, 0.0  ;;  %v1401_v2 = vmul.f32 0.1, %v1315_v29  ;;  %v1325_v4 = vadd.f32 %v3490_v44, %v3382_v18 }
 0x197   : > { %2699 = vmatmul.mubr.msk.f32.gmra.mrb[32].mxu1 %vm1448_vm4, %v1422_v51  ;;  %v1431_v52 = vsel %vm1367_vm11, %v1305_v33, %v1399_v61  ;;  %v1400_v7 = vmul.f32 0.1, %v1310_v9  ;;  %v1320_v13 = vadd.f32 %v3371_v12, %v3490_v44  ;;  %vm1369_vm13 = vcmp.ge.f32.partialorder %v1315_v29, 0.0 }
 0x198   : > { %2701 = vmatprep.mubr.msk.f32.mxu1 %vm1448_vm4, %v1423_v34  ;;  %v1430_v46 = vsel %vm1366_vm12, %v1300_v3, %v1398_v35  ;;  %vm1368_vm14 = vcmp.ge.f32.partialorder %v1310_v9, 0.0  ;;  %v1403_v8 = vmul.f32 0.1, %v1325_v4  ;;  %v1433_v23 = vsel %vm1369_vm13, %v1315_v29, %v1401_v2 }
 0x199   : > { %v1335_v5 = vadd.f32 %v3490_v44, %v3391_v25  ;;  %v1402_v34 = vmul.f32 0.1, %v1320_v13  ;;  %v1330_v18 = vadd.f32 %v3380_v17, %v3490_v44  ;;  %vm1371_vm15 = vcmp.ge.f32.partialorder %v1325_v4, 0.0 }
 0x19a   : > { %v1432_v57 = vsel %vm1368_vm14, %v1310_v9, %v1400_v7  ;;  %vm1370_vm0 = vcmp.ge.f32.partialorder %v1320_v13, 0.0  ;;  %v1435_v30 = vsel %vm1371_vm15, %v1325_v4, %v1403_v8  ;;  %v1340_v51 = vadd.f32 %v3389_v22, %v3490_v44  ;;  %v1912_v44 = vld [vmem:[%s4050_s8 + $0x70] sm:$0xff]  ;;  %v1913_v22 = vld [vmem:[%s4050_s8 + $0x78] sm:$0xff] }
 0x19b   : > { %2702 = vmatmul.mubr.msk.f32.gmra.mrb[34].mxu1 %vm1448_vm4, %v1424_v14  ;;  %v1405_v12 = vmul.f32 0.1, %v1335_v5  ;;  %v1404_v0 = vmul.f32 0.1, %v1330_v18  ;;  %vm1373_vm1 = vcmp.ge.f32.partialorder %v1335_v5, 0.0  ;;  %v1434_v26 = vsel %vm1370_vm0, %v1320_v13, %v1402_v34 }
 0x19c   : > { %2704 = vmatprep.mubr.msk.f32.mxu1 %vm1448_vm4, %v1425_v15  ;;  %vm1372_vm2 = vcmp.ge.f32.partialorder %v1330_v18, 0.0  ;;  %v1406_v25 = vmul.f32 0.1, %v1340_v51  ;;  %vm1374_vm3 = vcmp.ge.f32.partialorder %v1340_v51, 0.0  ;;  %v2845_v41 = vpack.c.bf16 %v1913_v22, %v1912_v44 }
 0x19d   : > { %v1437_v17 = vsel %vm1373_vm1, %v1335_v5, %v1405_v12  ;;  %v1436_v15 = vsel %vm1372_vm2, %v1330_v18, %v1404_v0  ;;  %v431_v62 = vsub.s32 1, %v3135_v27 }
 0x19e   : > { %v1438_v38 = vsel %vm1374_vm3, %v1340_v51, %v1406_v25  ;;  %2846 = vmatprep.subr.bf16.mxu1 %v2845_v41 }
 0x19f   : > { %2705 = vmatmul.mubr.msk.f32.gmra.mrb[36].mxu1 %vm1448_vm4, %v1426_v59  ;;  %v3620_v14 = vrot.slane %v3146_v31, %v431_v62 }
 0x1a0   : > { %2707 = vmatprep.mubr.msk.f32.mxu1 %vm1448_vm4, %v1427_v63  ;;  %2848 = vmatpush3.bf16.msra.mxu1 %v2845_v41 }
 0x1a1   : > { %v601_v56 = vadd.f32 %v3285_v24, %v3620_v14  ;;  %v607_v63 = vadd.f32 %v3290_v28, %v3620_v14  ;;  %v613_v33 = vadd.f32 %v3295_v32, %v3620_v14  ;;  %v619_v54 = vadd.f32 %v3300_v36, %v3620_v14 }
 0x1a2   : > { %v625_v3 = vadd.f32 %v3305_v39, %v3620_v14  ;;  %v631_v27 = vadd.f32 %v3310_v42, %v3620_v14  ;;  %v637_v24 = vadd.f32 %v3315_v45, %v3620_v14  ;;  %v643_v32 = vadd.f32 %v3324_v50, %v3620_v14  ;;  %v3643_v42 = vld [vmem:[%s4049_s7] ss:$0 sm:$0xff] }
 0x1a3   : > { %2708 = vmatmul.mubr.msk.f32.gmra.mrb[38].mxu1 %vm1448_vm4, %v1428_v47  ;;  %v854_v59 = vmul.f32 0.1, %v601_v56  ;;  %v856_v31 = vmul.f32 0.1, %v607_v63  ;;  %vm792_vm5 = vcmp.ge.f32.partialorder %v607_v63, 0.0  ;;  %vm794_vm6 = vcmp.ge.f32.partialorder %v613_v33, 0.0 }
 0x1a4   : > { %2710 = vmatprep.mubr.msk.f32.mxu1 %vm1448_vm4, %v1429_v49  ;;  %v858_v28 = vmul.f32 0.1, %v613_v33  ;;  %v860_v61 = vmul.f32 0.1, %v619_v54  ;;  %vm796_vm7 = vcmp.ge.f32.partialorder %v619_v54, 0.0  ;;  %v649_v39 = vadd.f32 %v3333_v55, %v3620_v14 }
 0x1a5   : > { %v862_v36 = vmul.f32 0.1, %v625_v3  ;;  %vm798_vm8 = vcmp.ge.f32.partialorder %v625_v3, 0.0  ;;  %v864_v49 = vmul.f32 0.1, %v631_v27  ;;  %v920_v29 = vsel %vm792_vm5, %v607_v63, %v856_v31 }
 0x1a6   : > { %vm800_vm9 = vcmp.ge.f32.partialorder %v631_v27, 0.0  ;;  %v866_v35 = vmul.f32 0.1, %v637_v24  ;;  %v655_v50 = vadd.f32 %v3342_v60, %v3620_v14  ;;  %vm802_vm10 = vcmp.ge.f32.partialorder %v637_v24, 0.0 }
 0x1a7   : > { %2711 = vmatmul.mubr.msk.f32.gmra.mrb[40].mxu1 %vm1448_vm4, %v1430_v46  ;;  %v868_v9 = vmul.f32 0.1, %v643_v32  ;;  %v922_v2 = vsel %vm794_vm6, %v613_v33, %v858_v28  ;;  %vm804_vm11 = vcmp.ge.f32.partialorder %v643_v32, 0.0  ;;  %v870_v55 = vmul.f32 0.1, %v649_v39 }
 0x1a8   : > { %2713 = vmatprep.mubr.msk.f32.mxu1 %vm1448_vm4, %v1431_v52  ;;  %v924_v52 = vsel %vm796_vm7, %v619_v54, %v860_v61  ;;  %v3649_v13 = vsel %vm798_vm8, %v625_v3, %v862_v36  ;;  %vm806_vm12 = vcmp.ge.f32.partialorder %v649_v39, 0.0  ;;  %v661_v46 = vadd.f32 %v3351_v1, %v3620_v14 }
 0x1a9   : > { %v928_v60 = vsel %vm800_vm9, %v631_v27, %v864_v49  ;;  %vm808_vm13 = vcmp.ge.f32.partialorder %v655_v50, 0.0  ;;  %v3656_v5 = vsel %vm802_vm10, %v637_v24, %v866_v35  ;;  %v872_v34 = vmul.f32 0.1, %v655_v50 }
 0x1aa   : > { %v3659_v12 = vsel %vm804_vm11, %v643_v32, %v868_v9  ;;  %v667_v1 = vadd.f32 %v3360_v6, %v3620_v14  ;;  %vm810_vm0 = vcmp.ge.f32.partialorder %v661_v46, 0.0  ;;  %v3670_v41 = vadd.f32 %v3369_v11, %v3620_v14 }
 0x1ab   : > { %2714 = vmatmul.mubr.msk.f32.gmra.mrb[42].mxu1 %vm1448_vm4, %v1432_v57  ;;  %v679_v24 = vadd.f32 %v3378_v16, %v3620_v14  ;;  %v685_v32 = vadd.f32 %v3387_v21, %v3620_v14 }
 0x1ac   : > { %2716 = vmatprep.mubr.msk.f32.mxu1 %vm1448_vm4, %v1433_v23  ;;  %vm812_vm3 = vcmp.ge.f32.partialorder %v667_v1, 0.0  ;;  %v876_v63 = vmul.f32 0.1, %v667_v1  ;;  %vm814_vm5 = vcmp.ge.f32.partialorder %v3670_v41, 0.0  ;;  %v878_v49 = vmul.f32 0.1, %v3670_v41 }
 0x1ad   : > { %vm816_vm8 = vcmp.ge.f32.partialorder %v679_v24, 0.0  ;;  %vm818_vm9 = vcmp.ge.f32.partialorder %v685_v32, 0.0 }
 0x1ae   : > { %v940_v21 = vsel %vm812_vm3, %v667_v1, %v876_v63 }
 0x1af   : > { %2717 = vmatmul.mubr.msk.f32.gmra.mrb[44].mxu1 %vm1448_vm4, %v1434_v26  ;;  %v3665_v26 = vsel %vm806_vm12, %v649_v39, %v870_v55 }
 0x1b0   : > { %2719 = vmatprep.mubr.msk.f32.mxu1 %vm1448_vm4, %v1435_v30 }
 0x1b3   : > { %2720 = vmatmul.mubr.msk.f32.gmra.mrb[46].mxu1 %vm1448_vm4, %v1436_v15 }
 0x1b4   : > { %2722 = vmatprep.mubr.msk.f32.mxu1 %vm1448_vm4, %v1437_v17  ;;  %v874_v17 = vmul.f32 0.1, %v661_v46 }
 0x1b6   : > { %v3678_v11 = vsel %vm810_vm0, %v661_v46, %v874_v17  ;;  %v942_v17 = vsel %vm814_vm5, %v3670_v41, %v878_v49  ;;  %v721_v49 = vadd.f32 %v3430_v58, %v3620_v14 }
 0x1b7   : > { %2723 = vmatmul.mubr.msk.f32.gmra.mrb[48].mxu1 %vm1448_vm4, %v1438_v38  ;;  %vm790_vm4 = vcmp.ge.f32.partialorder %v601_v56, 0.0 }
 0x1b8   : > { %v918_v45 = vsel %vm790_vm4, %v601_v56, %v854_v59  ;;  %v3673_v56 = vsel %vm808_vm13, %v655_v50, %v872_v34 }
 0x24e   : > { %v2679_v47 = vpop.f32.mrb[18].mxu1 }
 0x24f   : > { %v1617_v4 = vadd.f32 %v2679_v47, %v3643_v42  ;;  %v1611_v7 = vpop.f32.mrb[19].mxu1 }
 0x250   : > { %v1612_v8 = vadd.f32 %v3643_v42, %v1611_v7  ;;  %v882_v7 = vmul.f32 0.1, %v685_v32 }
 0x251   : > { %vm1771_vm14 = vcmp.ge.f32.partialorder %v1617_v4, 0.0  ;;  %v1803_v23 = vmul.f32 0.1, %v1617_v4 }
 0x252   : > { %vm1770_vm15 = vcmp.ge.f32.partialorder %v1612_v8, 0.0  ;;  %v1802_v18 = vmul.f32 0.1, %v1612_v8  ;;  %v2682_v57 = vpop.f32.mrb[20].mxu1 }
 0x253   : > { %v1835_v30 = vsel %vm1771_vm14, %v1617_v4, %v1803_v23  ;;  %v1627_v0 = vadd.f32 %v2682_v57, %v3643_v42  ;;  %v1621_v51 = vpop.f32.mrb[21].mxu1 }
 0x254   : > { %v1867_v25 = vadd.f32 %v1835_v30, %v920_v29  ;;  %v1622_v15 = vadd.f32 %v3643_v42, %v1621_v51  ;;  %v1834_v38 = vsel %vm1770_vm15, %v1612_v8, %v1802_v18 }
 0x255   : > { %vm1773_vm1 = vcmp.ge.f32.partialorder %v1627_v0, 0.0  ;;  %v1805_v44 = vmul.f32 0.1, %v1627_v0  ;;  %v1866_v22 = vadd.f32 %v1834_v38, %v918_v45  ;;  %v691_v45 = vadd.f32 %v3396_v37, %v3620_v14 }
 0x256   : > { %vm1772_vm2 = vcmp.ge.f32.partialorder %v1622_v15, 0.0  ;;  %v1804_v6 = vmul.f32 0.1, %v1622_v15  ;;  %v2685_v62 = vpop.f32.mrb[22].mxu1 }
 0x257   : > { %v1637_v33 = vadd.f32 %v2685_v62, %v3643_v42  ;;  %v1631_v54 = vpop.f32.mrb[23].mxu1  ;;  %2757 = vmatprep.mubr.f32.mxu1 %v1866_v22  ;;  %v1837_v3 = vsel %vm1773_vm1, %v1627_v0, %v1805_v44  ;;  %vm820_vm11 = vcmp.ge.f32.partialorder %v691_v45, 0.0  ;;  %v3706_v44 = vsel %vm818_vm9, %v685_v32, %v882_v7 }
 0x258   : > { %v1632_v59 = vadd.f32 %v3643_v42, %v1631_v54  ;;  %2758 = vmatmul.mubr.f32.vlgmr.msra.gmra.mrb[50].mxu1 %v1867_v25  ;;  %v1836_v27 = vsel %vm1772_vm2, %v1622_v15, %v1804_v6  ;;  %v1869_v31 = vadd.f32 %v1837_v3, %v924_v52  ;;  %v703_v15 = vadd.f32 %v3412_v10, %v3620_v14 }
 0x259   : > { %vm1775_vm4 = vcmp.ge.f32.partialorder %v1637_v33, 0.0  ;;  %v1807_v28 = vmul.f32 0.1, %v1637_v33  ;;  %v1868_v61 = vadd.f32 %v1836_v27, %v922_v2  ;;  %v880_v2 = vmul.f32 0.1, %v679_v24 }
 0x25a   : > { %vm1774_vm6 = vcmp.ge.f32.partialorder %v1632_v59, 0.0  ;;  %v1806_v36 = vmul.f32 0.1, %v1632_v59  ;;  %v2688_v39 = vpop.f32.mrb[24].mxu1  ;;  %vm824_vm1 = vcmp.ge.f32.partialorder %v703_v15, 0.0  ;;  %v727_v7 = vadd.f32 %v3435_v19, %v3620_v14 }
 0x25b   : > { %v1647_v29 = vadd.f32 %v2688_v39, %v3643_v42  ;;  %v1641_v35 = vpop.f32.mrb[25].mxu1  ;;  %2760 = vmatprep.mubr.f32.mxu1 %v1868_v61  ;;  %v1839_v16 = vsel %vm1775_vm4, %v1637_v33, %v1807_v28  ;;  %v944_v25 = vsel %vm816_vm8, %v679_v24, %v880_v2  ;;  %v709_v33 = vadd.f32 %v3420_v40, %v3620_v14 }
 0x25c   : > { %v1642_v50 = vadd.f32 %v3643_v42, %v1641_v35  ;;  %2761 = vmatmul.mubr.f32.gmra.mrb[52].mxu1 %v1869_v31  ;;  %v1838_v9 = vsel %vm1774_vm6, %v1632_v59, %v1806_v36  ;;  %v1871_v47 = vadd.f32 %v1839_v16, %v928_v60  ;;  %v884_v60 = vmul.f32 0.1, %v691_v45 }
 0x25d   : > { %vm1777_vm7 = vcmp.ge.f32.partialorder %v1647_v29, 0.0  ;;  %v1809_v52 = vmul.f32 0.1, %v1647_v29  ;;  %v1870_v55 = vadd.f32 %v1838_v9, %v3649_v13  ;;  %v697_v13 = vadd.f32 %v3401_v48, %v3620_v14 }
 0x25e   : > { %vm1776_vm10 = vcmp.ge.f32.partialorder %v1642_v50, 0.0  ;;  %v1808_v37 = vmul.f32 0.1, %v1642_v50  ;;  %v2691_v4 = vpop.f32.mrb[26].mxu1  ;;  %v948_v41 = vsel %vm820_vm11, %v691_v45, %v884_v60  ;;  %v888_v59 = vmul.f32 0.1, %v703_v15 }
 0x25f   : > { %v1657_v46 = vadd.f32 %v2691_v4, %v3643_v42  ;;  %v1651_v8 = vpop.f32.mrb[27].mxu1  ;;  %2763 = vmatprep.mubr.f32.mxu1 %v1870_v55  ;;  %v1841_v23 = vsel %vm1777_vm7, %v1647_v29, %v1809_v52  ;;  %v886_v62 = vmul.f32 0.1, %v697_v13  ;;  %vm822_vm15 = vcmp.ge.f32.partialorder %v697_v13, 0.0 }
 0x260   : > { %v1652_v34 = vadd.f32 %v3643_v42, %v1651_v8  ;;  %2764 = vmatmul.mubr.f32.gmra.mrb[54].mxu1 %v1871_v47  ;;  %v1840_v18 = vsel %vm1776_vm10, %v1642_v50, %v1808_v37  ;;  %v1873_v57 = vadd.f32 %v1841_v23, %v3659_v12  ;;  %v715_v24 = vadd.f32 %v3425_v20, %v3620_v14 }
 0x261   : > { %vm1779_vm12 = vcmp.ge.f32.partialorder %v1657_v46, 0.0  ;;  %v1811_v1 = vmul.f32 0.1, %v1657_v46  ;;  %v1872_v30 = vadd.f32 %v1840_v18, %v3656_v5  ;;  %v950_v36 = vsel %vm822_vm15, %v697_v13, %v886_v62 }
 0x262   : > { %vm1778_vm13 = vcmp.ge.f32.partialorder %v1652_v34, 0.0  ;;  %v1810_v0 = vmul.f32 0.1, %v1652_v34  ;;  %v2694_v51 = vpop.f32.mrb[28].mxu1  ;;  %v890_v39 = vmul.f32 0.1, %v709_v33  ;;  %v952_v50 = vsel %vm824_vm1, %v703_v15, %v888_v59 }
 0x263   : > { %v1667_v12 = vadd.f32 %v2694_v51, %v3643_v42  ;;  %v1661_v38 = vpop.f32.mrb[29].mxu1  ;;  %2766 = vmatprep.mubr.f32.mxu1 %v1872_v30  ;;  %v1843_v48 = vsel %vm1779_vm12, %v1657_v46, %v1811_v1  ;;  %vm826_vm4 = vcmp.ge.f32.partialorder %v709_v33, 0.0  ;;  %v892_v9 = vmul.f32 0.1, %v715_v24 }
 0x264   : > { %v1662_v5 = vadd.f32 %v3643_v42, %v1661_v38  ;;  %2767 = vmatmul.mubr.f32.gmra.mrb[56].mxu1 %v1873_v57  ;;  %v1842_v22 = vsel %vm1778_vm13, %v1652_v34, %v1810_v0  ;;  %v1875_v6 = vadd.f32 %v1843_v48, %v3673_v56  ;;  %vm828_vm5 = vcmp.ge.f32.partialorder %v715_v24, 0.0 }
 0x265   : > { %vm1781_vm14 = vcmp.ge.f32.partialorder %v1667_v12, 0.0  ;;  %v1813_v63 = vmul.f32 0.1, %v1667_v12  ;;  %v1874_v10 = vadd.f32 %v1842_v22, %v3665_v26  ;;  %v894_v52 = vmul.f32 0.1, %v721_v49 }
 0x266   : > { %vm1780_vm0 = vcmp.ge.f32.partialorder %v1662_v5, 0.0  ;;  %v1812_v54 = vmul.f32 0.1, %v1662_v5  ;;  %v2697_v3 = vpop.f32.mrb[30].mxu1  ;;  %v954_v4 = vsel %vm826_vm4, %v709_v33, %v890_v39  ;;  %vm830_vm8 = vcmp.ge.f32.partialorder %v721_v49, 0.0 }
 0x267   : > { %v1677_v27 = vadd.f32 %v2697_v3, %v3643_v42  ;;  %v1671_v31 = vpop.f32.mrb[31].mxu1  ;;  %2769 = vmatprep.mubr.f32.mxu1 %v1874_v10  ;;  %v1845_v56 = vsel %vm1781_vm14, %v1667_v12, %v1813_v63  ;;  %v956_v57 = vsel %vm828_vm5, %v715_v24, %v892_v9  ;;  %v733_v13 = vadd.f32 %v3440_v43, %v3620_v14  ;;  %v4128_v24 = vld [vmem:[#allocation32_spill] sm:$0xff] }
 0x268   : > { %v1672_v28 = vadd.f32 %v3643_v42, %v1671_v31  ;;  %2770 = vmatmul.mubr.f32.gmra.mrb[58].mxu1 %v1875_v6  ;;  %v1844_v26 = vsel %vm1780_vm0, %v1662_v5, %v1812_v54  ;;  %v1877_v61 = vadd.f32 %v1845_v56, %v940_v21  ;;  %v739_v19 = vadd.f32 %v3445_v53, %v3620_v14 }
 0x269   : > { %vm1783_vm2 = vcmp.ge.f32.partialorder %v1677_v27, 0.0  ;;  %v1815_v40 = vmul.f32 0.1, %v1677_v27  ;;  %v1876_v32 = vadd.f32 %v1844_v26, %v3678_v11  ;;  %vm832_vm11 = vcmp.ge.f32.partialorder %v727_v7, 0.0 }
 0x26a   : > { %vm1782_vm3 = vcmp.ge.f32.partialorder %v1672_v28, 0.0  ;;  %v1814_v45 = vmul.f32 0.1, %v1672_v28  ;;  %v2700_v29 = vpop.f32.mrb[32].mxu1  ;;  %v896_v48 = vmul.f32 0.1, %v727_v7 }
 0x26b   : > { %v1687_v20 = vadd.f32 %v2700_v29, %v3643_v42  ;;  %v1681_v35 = vpop.f32.mrb[33].mxu1  ;;  %2772 = vmatprep.mubr.f32.mxu1 %v1876_v32  ;;  %v1847_v16 = vsel %vm1783_vm2, %v1677_v27, %v1815_v40  ;;  %v898_v22 = vmul.f32 0.1, %v733_v13  ;;  %vm834_vm13 = vcmp.ge.f32.partialorder %v733_v13, 0.0 }
 0x26c   : > { %v1682_v11 = vadd.f32 %v3643_v42, %v1681_v35  ;;  %2773 = vmatmul.mubr.f32.gmra.mrb[60].mxu1 %v1877_v61  ;;  %v1846_v47 = vsel %vm1782_vm3, %v1672_v28, %v1814_v45  ;;  %v1879_v21 = vadd.f32 %v1847_v16, %v944_v25  ;;  %v4127_v25 = vld [vmem:[#allocation30_spill] sm:$0xff]  ;;  %vm836_vm14 = vcmp.ge.f32.partialorder %v739_v19, 0.0 }
 0x26d   : > { %vm1785_vm6 = vcmp.ge.f32.partialorder %v1687_v20, 0.0  ;;  %v1817_v58 = vmul.f32 0.1, %v1687_v20  ;;  %v1878_v2 = vadd.f32 %v1846_v47, %v942_v17  ;;  %v958_v17 = vsel %vm830_vm8, %v721_v49, %v894_v52  ;;  %v4129_v49 = vld [vmem:[#allocation34_spill] sm:$0xff]  ;;  %v4130_v52 = vld [vmem:[#allocation36_spill] sm:$0xff] }
 0x26e   : > { %vm1784_vm7 = vcmp.ge.f32.partialorder %v1682_v11, 0.0  ;;  %v1816_v55 = vmul.f32 0.1, %v1682_v11  ;;  %v2703_v37 = vpop.f32.mrb[34].mxu1  ;;  %v745_v15 = vadd.f32 %v4127_v25, %v3620_v14  ;;  %v900_v10 = vmul.f32 0.1, %v739_v19 }
 0x26f   : > { %v1697_v46 = vadd.f32 %v2703_v37, %v3643_v42  ;;  %v1691_v8 = vpop.f32.mrb[35].mxu1  ;;  %2775 = vmatprep.mubr.f32.mxu1 %v1878_v2  ;;  %v1849_v23 = vsel %vm1785_vm6, %v1687_v20, %v1817_v58  ;;  %v751_v28 = vadd.f32 %v4128_v24, %v3620_v14  ;;  %v962_v39 = vsel %vm834_vm13, %v733_v13, %v898_v22 }
 0x270   : > { %v1692_v60 = vadd.f32 %v3643_v42, %v1691_v8  ;;  %2776 = vmatmul.mubr.f32.gmra.mrb[62].mxu1 %v1879_v21  ;;  %v1848_v34 = vsel %vm1784_vm7, %v1682_v11, %v1816_v55  ;;  %v1881_v18 = vadd.f32 %v1849_v23, %v948_v41  ;;  %vm838_vm0 = vcmp.ge.f32.partialorder %v745_v15, 0.0 }
 0x271   : > { %vm1787_vm9 = vcmp.ge.f32.partialorder %v1697_v46, 0.0  ;;  %v1819_v1 = vmul.f32 0.1, %v1697_v46  ;;  %v1880_v30 = vadd.f32 %v1848_v34, %v3706_v44  ;;  %v902_v59 = vmul.f32 0.1, %v745_v15 }
 0x272   : > { %vm1786_vm10 = vcmp.ge.f32.partialorder %v1692_v60, 0.0  ;;  %v1818_v0 = vmul.f32 0.1, %v1692_v60  ;;  %v2706_v51 = vpop.f32.mrb[36].mxu1  ;;  %v3749_v45 = vadd.f32 %v4129_v49, %v3620_v14  ;;  %v964_v16 = vsel %vm836_vm14, %v739_v19, %v900_v10 }
 0x273   : > { %v1707_v12 = vadd.f32 %v2706_v51, %v3643_v42  ;;  %v1701_v38 = vpop.f32.mrb[37].mxu1  ;;  %2778 = vmatprep.mubr.f32.mxu1 %v1880_v30  ;;  %v1851_v43 = vsel %vm1787_vm9, %v1697_v46, %v1819_v1  ;;  %v966_v47 = vsel %vm838_vm0, %v745_v15, %v902_v59  ;;  %vm840_vm3 = vcmp.ge.f32.partialorder %v751_v28, 0.0  ;;  %v4132_v1 = vld [vmem:[#allocation40_spill] sm:$0xff] }
 0x274   : > { %v1702_v44 = vadd.f32 %v3643_v42, %v1701_v38  ;;  %2779 = vmatmul.mubr.f32.gmra.mrb[64].mxu1 %v1881_v18  ;;  %v1850_v5 = vsel %vm1786_vm10, %v1692_v60, %v1818_v0  ;;  %v1883_v53 = vadd.f32 %v1851_v43, %v952_v50  ;;  %v904_v2 = vmul.f32 0.1, %v751_v28 }
 0x275   : > { %vm1789_vm12 = vcmp.ge.f32.partialorder %v1707_v12, 0.0  ;;  %v1821_v6 = vmul.f32 0.1, %v1707_v12  ;;  %v1882_v41 = vadd.f32 %v1850_v5, %v950_v36  ;;  %v960_v36 = vsel %vm832_vm11, %v727_v7, %v896_v48  ;;  %v4131_v7 = vld [vmem:[#allocation38_spill] sm:$0xff] }
 0x276   : > { %vm1788_vm15 = vcmp.ge.f32.partialorder %v1702_v44, 0.0  ;;  %v1820_v62 = vmul.f32 0.1, %v1702_v44  ;;  %v2709_v63 = vpop.f32.mrb[38].mxu1  ;;  %v763_v55 = vadd.f32 %v4130_v52, %v3620_v14  ;;  %vm842_vm6 = vcmp.ge.f32.partialorder %v3749_v45, 0.0 }
 0x277   : > { %v1717_v33 = vadd.f32 %v2709_v63, %v3643_v42  ;;  %v1711_v54 = vpop.f32.mrb[39].mxu1  ;;  %2781 = vmatprep.mubr.f32.mxu1 %v1882_v41  ;;  %v1853_v3 = vsel %vm1789_vm12, %v1707_v12, %v1821_v6  ;;  %v769_v46 = vadd.f32 %v4131_v7, %v3620_v14  ;;  %v906_v34 = vmul.f32 0.1, %v3749_v45 }
 0x278   : > { %v1712_v27 = vadd.f32 %v3643_v42, %v1711_v54  ;;  %2782 = vmatmul.mubr.f32.gmra.mrb[66].mxu1 %v1883_v53  ;;  %v1852_v31 = vsel %vm1788_vm15, %v1702_v44, %v1820_v62  ;;  %v1885_v56 = vadd.f32 %v1853_v3, %v956_v57  ;;  %v775_v30 = vadd.f32 %v4132_v1, %v3620_v14  ;;  %v4134_v3 = vld [vmem:[#allocation44_spill] sm:$0xff] }
 0x279   : > { %vm1791_vm1 = vcmp.ge.f32.partialorder %v1717_v33, 0.0  ;;  %v1823_v26 = vmul.f32 0.1, %v1717_v33  ;;  %v1884_v61 = vadd.f32 %v1852_v31, %v954_v4  ;;  %v908_v51 = vmul.f32 0.1, %v763_v55 }
 0x27a   : > { %vm1790_vm2 = vcmp.ge.f32.partialorder %v1712_v27, 0.0  ;;  %v1822_v40 = vmul.f32 0.1, %v1712_v27  ;;  %v2712_v32 = vpop.f32.mrb[40].mxu1  ;;  %v968_v15 = vsel %vm840_vm3, %v751_v28, %v904_v2  ;;  %vm844_vm9 = vcmp.ge.f32.partialorder %v763_v55, 0.0 }
 0x27b   : > { %v1727_v29 = vadd.f32 %v2712_v32, %v3643_v42  ;;  %v1721_v20 = vpop.f32.mrb[41].mxu1  ;;  %2784 = vmatprep.mubr.f32.mxu1 %v1884_v61  ;;  %v1855_v35 = vsel %vm1791_vm1, %v1717_v33, %v1823_v26  ;;  %vm846_vm10 = vcmp.ge.f32.partialorder %v769_v46, 0.0  ;;  %v910_v48 = vmul.f32 0.1, %v769_v46  ;;  %v4133_v33 = vld [vmem:[#allocation42_spill] sm:$0xff] }
 0x27c   : > { %v1722_v50 = vadd.f32 %v3643_v42, %v1721_v20  ;;  %2785 = vmatmul.mubr.f32.gmra.mrb[68].mxu1 %v1885_v56  ;;  %v1854_v9 = vsel %vm1790_vm2, %v1712_v27, %v1822_v40  ;;  %v1887_v11 = vadd.f32 %v1855_v35, %v960_v36  ;;  %vm848_vm11 = vcmp.ge.f32.partialorder %v775_v30, 0.0 }
 0x27d   : > { %vm1793_vm4 = vcmp.ge.f32.partialorder %v1727_v29, 0.0  ;;  %v1825_v21 = vmul.f32 0.1, %v1727_v29  ;;  %v1886_v58 = vadd.f32 %v1854_v9, %v958_v17  ;;  %v912_v41 = vmul.f32 0.1, %v775_v30 }
 0x27e   : > { %vm1792_vm5 = vcmp.ge.f32.partialorder %v1722_v50, 0.0  ;;  %v1824_v37 = vmul.f32 0.1, %v1722_v50  ;;  %v2715_v4 = vpop.f32.mrb[42].mxu1  ;;  %v972_v10 = vsel %vm844_vm9, %v763_v55, %v908_v51  ;;  %v781_v54 = vadd.f32 %v4133_v33, %v3620_v14 }
 0x27f   : > { %v1737_v8 = vadd.f32 %v2715_v4, %v3643_v42  ;;  %v1731_v23 = vpop.f32.mrb[43].mxu1  ;;  %2787 = vmatprep.mubr.f32.mxu1 %v1886_v58  ;;  %v1857_v60 = vsel %vm1793_vm4, %v1727_v29, %v1825_v21  ;;  %v787_v59 = vadd.f32 %v4134_v3, %v3620_v14  ;;  %v970_v28 = vsel %vm842_vm6, %v3749_v45, %v906_v34 }
 0x280   : > { %v1732_v18 = vadd.f32 %v3643_v42, %v1731_v23  ;;  %2788 = vmatmul.mubr.f32.gmra.mrb[70].mxu1 %v1887_v11  ;;  %v1856_v57 = vsel %vm1792_vm5, %v1722_v50, %v1824_v37  ;;  %v1889_v13 = vadd.f32 %v1857_v60, %v964_v16  ;;  %v976_v49 = vsel %vm848_vm11, %v775_v30, %v912_v41  ;;  %v4136_v23 = vld [vmem:[#allocation6_spill] sm:$0xff]  ;;  %v4137_v30 = vld [vmem:[#allocation7_spill] sm:$0xff] }
 0x281   : > { %vm1795_vm7 = vcmp.ge.f32.partialorder %v1737_v8, 0.0  ;;  %v1827_v19 = vmul.f32 0.1, %v1737_v8  ;;  %v1888_v0 = vadd.f32 %v1856_v57, %v962_v39  ;;  %v974_v39 = vsel %vm846_vm10, %v769_v46, %v910_v48  ;;  %v4135_v46 = vld [vmem:[#allocation5_spill] sm:$0xff] }
 0x282   : > { %vm1794_vm8 = vcmp.ge.f32.partialorder %v1732_v18, 0.0  ;;  %v1826_v17 = vmul.f32 0.1, %v1732_v18  ;;  %v2718_v25 = vpop.f32.mrb[44].mxu1  ;;  %v914_v29 = vmul.f32 0.1, %v781_v54 }
 0x283   : > { %v1747_v12 = vadd.f32 %v2718_v25, %v3643_v42  ;;  %v1741_v38 = vpop.f32.mrb[45].mxu1  ;;  %2790 = vmatprep.mubr.f32.mxu1 %v1888_v0  ;;  %v1859_v43 = vsel %vm1795_vm7, %v1737_v8, %v1827_v19  ;;  %v916_v20 = vmul.f32 0.1, %v787_v59  ;;  %vm852_vm0 = vcmp.ge.f32.partialorder %v787_v59, 0.0 }
 0x284   : > { %v1742_v44 = vadd.f32 %v3643_v42, %v1741_v38  ;;  %2791 = vmatmul.mubr.f32.gmra.mrb[72].mxu1 %v1889_v13  ;;  %v1858_v5 = vsel %vm1794_vm8, %v1732_v18, %v1826_v17  ;;  %v1891_v53 = vadd.f32 %v1859_v43, %v968_v15  ;;  %vm850_vm1 = vcmp.ge.f32.partialorder %v781_v54, 0.0  ;;  %v4138_v15 = vld [vmem:[#allocation8_spill] sm:$0xff] }
 0x285   : > { %vm1797_vm12 = vcmp.ge.f32.partialorder %v1747_v12, 0.0  ;;  %v1829_v22 = vmul.f32 0.1, %v1747_v12  ;;  %v1890_v6 = vadd.f32 %v1858_v5, %v966_v47  ;;  %v980_v2 = vsel %vm852_vm0, %v787_v59, %v916_v20  ;;  %v4142_v20 = vld [vmem:[#allocation12_spill] sm:$0xff] }
 0x286   : > { %vm1796_vm13 = vcmp.ge.f32.partialorder %v1742_v44, 0.0  ;;  %v1828_v62 = vmul.f32 0.1, %v1742_v44  ;;  %v2721_v63 = vpop.f32.mrb[46].mxu1  ;;  %v978_v55 = vsel %vm850_vm1, %v781_v54, %v914_v29  ;;  %v853_v8 = vmul.f32 0.1, %v4135_v46 }
 0x287   : > { %v1757_v27 = vadd.f32 %v2721_v63, %v3643_v42  ;;  %v1751_v31 = vpop.f32.mrb[47].mxu1  ;;  %2793 = vmatprep.mubr.f32.mxu1 %v1890_v6  ;;  %v1861_v56 = vsel %vm1797_vm12, %v1747_v12, %v1829_v22  ;;  %vm789_vm4 = vcmp.ge.f32.partialorder %v4135_v46, 0.0  ;;  %v855_v60 = vmul.f32 0.1, %v4136_v23 }
 0x288   : > { %v1752_v24 = vadd.f32 %v3643_v42, %v1751_v31  ;;  %2794 = vmatmul.mubr.f32.gmra.mrb[74].mxu1 %v1891_v53  ;;  %v1860_v26 = vsel %vm1796_vm13, %v1742_v44, %v1828_v62  ;;  %v1893_v61 = vadd.f32 %v1861_v56, %v972_v10  ;;  %vm791_vm5 = vcmp.ge.f32.partialorder %v4136_v23, 0.0  ;;  %v4139_v44 = vld [vmem:[#allocation9_spill] sm:$0xff]  ;;  %v4140_v10 = vld [vmem:[#allocation10_spill] sm:$0xff] }
 0x289   : > { %vm1799_vm14 = vcmp.ge.f32.partialorder %v1757_v27, 0.0  ;;  %v1831_v40 = vmul.f32 0.1, %v1757_v27  ;;  %v1892_v32 = vadd.f32 %v1860_v26, %v970_v28  ;;  %v917_v1 = vsel %vm789_vm4, %v4135_v46, %v853_v8 }
 0x28a   : > { %vm1798_vm15 = vcmp.ge.f32.partialorder %v1752_v24, 0.0  ;;  %v1830_v36 = vmul.f32 0.1, %v1752_v24  ;;  %v2724_v14 = vpop.f32.mrb[48].mxu1  ;;  %vm793_vm6 = vcmp.ge.f32.partialorder %v4137_v30, 0.0  ;;  %v919_v0 = vsel %vm791_vm5, %v4136_v23, %v855_v60 }
 0x28b   : > { %v1767_v35 = vadd.f32 %v2724_v14, %v3643_v42  ;;  %v1761_v16 = vpop.f32.mrb[49].mxu1  ;;  %2796 = vmatprep.mubr.f32.mxu1 %v1892_v32  ;;  %v1863_v50 = vsel %vm1799_vm14, %v1757_v27, %v1831_v40  ;;  %v857_v51 = vmul.f32 0.1, %v4137_v30  ;;  %vm795_vm9 = vcmp.ge.f32.partialorder %v4138_v15, 0.0  ;;  %v4141_v40 = vld [vmem:[#allocation11_spill] sm:$0xff] }
 0x28c   : > { %v1762_v45 = vadd.f32 %v3643_v42, %v1761_v16  ;;  %2797 = vmatmul.mubr.f32.gmra.mrb[76].mxu1 %v1893_v61  ;;  %v1862_v9 = vsel %vm1798_vm15, %v1752_v24, %v1830_v36  ;;  %v1895_v11 = vadd.f32 %v1863_v50, %v976_v49  ;;  %v3785_v42 = vld [vmem:[%s4051_s9] ss:$0 sm:$0xff]  ;;  %v859_v12 = vmul.f32 0.1, %v4138_v15 }
 0x28d   : > { %vm1801_vm2 = vcmp.ge.f32.partialorder %v1767_v35, 0.0  ;;  %v1833_v47 = vmul.f32 0.1, %v1767_v35  ;;  %v1894_v21 = vadd.f32 %v1862_v9, %v974_v39  ;;  %v861_v5 = vmul.f32 0.1, %v4139_v44  ;;  %v4143_v9 = vld [vmem:[#allocation13_spill] sm:$0xff] }
 0x28e   : > { %vm1800_vm3 = vcmp.ge.f32.partialorder %v1762_v45, 0.0  ;;  %v1832_v58 = vmul.f32 0.1, %v1762_v45  ;;  %vm797_vm10 = vcmp.ge.f32.partialorder %v4139_v44, 0.0  ;;  %v921_v63 = vsel %vm793_vm6, %v4137_v30, %v857_v51  ;;  %v4145_v30 = vld [vmem:[#allocation15_spill] sm:$0xff] }
 0x28f   : > { %2799 = vmatprep.mubr.f32.mxu1 %v1894_v21  ;;  %v1865_v52 = vsel %vm1801_vm2, %v1767_v35, %v1833_v47  ;;  %v863_v33 = vmul.f32 0.1, %v4140_v10  ;;  %v923_v59 = vsel %vm795_vm9, %v4138_v15, %v859_v12  ;;  %vm799_vm13 = vcmp.ge.f32.partialorder %v4140_v10, 0.0  ;;  %v4146_v12 = vld [vmem:[#allocation16_spill] sm:$0xff] }
 0x290   : > { %2800 = vmatmul.mubr.f32.gmra.mrb[78].mxu1 %v1895_v11  ;;  %v1864_v37 = vsel %vm1800_vm3, %v1762_v45, %v1832_v58  ;;  %v1897_v4 = vadd.f32 %v1865_v52, %v980_v2  ;;  %v925_v24 = vsel %vm797_vm10, %v4139_v44, %v861_v5  ;;  %vm801_vm14 = vcmp.ge.f32.partialorder %v4141_v40, 0.0  ;;  %v4147_v5 = vld [vmem:[#allocation17_spill] sm:$0xff] }
 0x291   : > { %v1896_v7 = vadd.f32 %v1864_v37, %v978_v55  ;;  %v927_v14 = vsel %vm799_vm13, %v4140_v10, %v863_v33  ;;  %v865_v39 = vmul.f32 0.1, %v4141_v40  ;;  %vm803_vm1 = vcmp.ge.f32.partialorder %v4142_v20, 0.0  ;;  %v4144_v37 = vld [vmem:[#allocation14_spill] sm:$0xff] }
 0x292   : > { %v867_v35 = vmul.f32 0.1, %v4142_v20  ;;  %v869_v11 = vmul.f32 0.1, %v4143_v9  ;;  %vm805_vm2 = vcmp.ge.f32.partialorder %v4143_v9, 0.0  ;;  %vm807_vm5 = vcmp.ge.f32.partialorder %v4144_v37, 0.0 }
 0x293   : > { %2802 = vmatprep.mubr.f32.mxu1 %v1896_v7  ;;  %v929_v55 = vsel %vm801_vm14, %v4141_v40, %v865_v39  ;;  %vm809_vm6 = vcmp.ge.f32.partialorder %v4145_v30, 0.0  ;;  %vm811_vm9 = vcmp.ge.f32.partialorder %v4146_v12, 0.0  ;;  %vm813_vm10 = vcmp.ge.f32.partialorder %v4147_v5, 0.0  ;;  %v4148_v33 = vld [vmem:[#allocation18_spill] sm:$0xff] }
 0x294   : > { %2803 = vmatmul.mubr.f32.gmra.mrb[80].mxu1 %v1897_v4  ;;  %v871_v4 = vmul.f32 0.1, %v4144_v37  ;;  %v931_v8 = vsel %vm803_vm1, %v4142_v20, %v867_v35  ;;  %vm815_vm13 = vcmp.ge.f32.partialorder %v4148_v33, 0.0  ;;  %v4150_v35 = vld [vmem:[#allocation20_spill] sm:$0xff] }
 0x295   : > { %vm819_vm1 = vcmp.ge.f32.partialorder %v4150_v35, 0.0 }
 0x296   : > { %v935_v51 = vsel %vm807_vm5, %v4144_v37, %v871_v4  ;;  %v4152_v4 = vld [vmem:[#allocation22_spill] sm:$0xff] }
 0x297   : > { %vm823_vm5 = vcmp.ge.f32.partialorder %v4152_v4, 0.0 }
 0x32b   : > { %v2759_v34 = vpop.f32.mrb[50].mxu1 }
 0x32c   : > { %v1993_v18 = vadd.f32 %v2759_v34, %v3785_v42  ;;  %v1987_v57 = vpop.f32.mrb[51].mxu1 }
 0x32d   : > { %v1988_v13 = vadd.f32 %v3785_v42, %v1987_v57 }
 0x32e   : > { %vm2147_vm7 = vcmp.ge.f32.partialorder %v1993_v18, 0.0  ;;  %v2179_v19 = vmul.f32 0.1, %v1993_v18 }
 0x32f   : > { %vm2146_vm8 = vcmp.ge.f32.partialorder %v1988_v13, 0.0  ;;  %v2178_v17 = vmul.f32 0.1, %v1988_v13  ;;  %v2762_v25 = vpop.f32.mrb[52].mxu1 }
 0x330   : > { %v2211_v38 = vsel %vm2147_vm7, %v1993_v18, %v2179_v19  ;;  %v2003_v43 = vadd.f32 %v2762_v25, %v3785_v42  ;;  %v1997_v48 = vpop.f32.mrb[53].mxu1  ;;  %v933_v18 = vsel %vm805_vm2, %v4143_v9, %v869_v11  ;;  %v4151_v11 = vld [vmem:[#allocation21_spill] sm:$0xff] }
 0x331   : > { %v2243_v53 = vadd.f32 %v2211_v38, %v919_v0  ;;  %v2210_v22 = vsel %vm2146_vm8, %v1988_v13, %v2178_v17  ;;  %v1998_v6 = vadd.f32 %v3785_v42, %v1997_v48  ;;  %v873_v17 = vmul.f32 0.1, %v4145_v30 }
 0x332   : > { %v2242_v41 = vadd.f32 %v2210_v22, %v917_v1  ;;  %vm2149_vm11 = vcmp.ge.f32.partialorder %v2003_v43, 0.0  ;;  %v2181_v62 = vmul.f32 0.1, %v2003_v43  ;;  %v875_v38 = vmul.f32 0.1, %v4146_v12 }
 0x333   : > { %2275 = vst [vmem:[%s3810_s12 + $0x8] sm:$0xff] %v2243_v53  ;;  %vm2148_vm12 = vcmp.ge.f32.partialorder %v1998_v6, 0.0  ;;  %v2180_v54 = vmul.f32 0.1, %v1998_v6  ;;  %v2765_v3 = vpop.f32.mrb[54].mxu1  ;;  %v937_v10 = vsel %vm809_vm6, %v4145_v30, %v873_v17  ;;  %vm821_vm2 = vcmp.ge.f32.partialorder %v4151_v11, 0.0 }
 0x334   : > { %2274 = vst [vmem:[%s3810_s12] sm:$0xff] %v2242_v41  ;;  %v2213_v27 = vsel %vm2149_vm11, %v2003_v43, %v2181_v62  ;;  %v2013_v31 = vadd.f32 %v2765_v3, %v3785_v42  ;;  %v2007_v56 = vpop.f32.mrb[55].mxu1  ;;  %v877_v53 = vmul.f32 0.1, %v4147_v5 }
 0x335   : > { %v2245_v28 = vadd.f32 %v2213_v27, %v923_v59  ;;  %v2212_v26 = vsel %vm2148_vm12, %v1998_v6, %v2180_v54  ;;  %v2008_v61 = vadd.f32 %v3785_v42, %v2007_v56  ;;  %v879_v54 = vmul.f32 0.1, %v4148_v33 }
 0x336   : > { %v2244_v32 = vadd.f32 %v2212_v26, %v921_v63  ;;  %vm2151_vm15 = vcmp.ge.f32.partialorder %v2013_v31, 0.0  ;;  %v2183_v36 = vmul.f32 0.1, %v2013_v31  ;;  %v939_v27 = vsel %vm811_vm9, %v4146_v12, %v875_v38  ;;  %v4154_v38 = vld [vmem:[#allocation24_spill] sm:$0xff] }
 0x337   : > { %2277 = vst [vmem:[%s3810_s12 + $0x18] sm:$0xff] %v2245_v28  ;;  %vm2150_vm0 = vcmp.ge.f32.partialorder %v2008_v61, 0.0  ;;  %v2182_v49 = vmul.f32 0.1, %v2008_v61  ;;  %v2768_v29 = vpop.f32.mrb[56].mxu1  ;;  %v941_v28 = vsel %vm813_vm10, %v4147_v5, %v877_v53  ;;  %v943_v39 = vsel %vm815_vm13, %v4148_v33, %v879_v54  ;;  %v4155_v53 = vld [vmem:[#allocation25_spill] sm:$0xff] }
 0x338   : > { %2276 = vst [vmem:[%s3810_s12 + $0x10] sm:$0xff] %v2244_v32  ;;  %v2215_v16 = vsel %vm2151_vm15, %v2013_v31, %v2183_v36  ;;  %v2023_v50 = vadd.f32 %v2768_v29, %v3785_v42  ;;  %v2017_v45 = vpop.f32.mrb[57].mxu1  ;;  %v4149_v32 = vld [vmem:[#allocation19_spill] sm:$0xff]  ;;  %vm827_vm9 = vcmp.ge.f32.partialorder %v4154_v38, 0.0  ;;  %vm829_vm10 = vcmp.ge.f32.partialorder %v4155_v53, 0.0  ;;  %v4156_v54 = vld [vmem:[#allocation26_spill] sm:$0xff] }
 0x339   : > { %v2247_v47 = vadd.f32 %v2215_v16, %v927_v14  ;;  %v2214_v21 = vsel %vm2150_vm0, %v2008_v61, %v2182_v49  ;;  %v2018_v58 = vadd.f32 %v3785_v42, %v2017_v45  ;;  %vm817_vm14 = vcmp.ge.f32.partialorder %v4149_v32, 0.0 }
 0x33a   : > { %v2246_v2 = vadd.f32 %v2214_v21, %v925_v24  ;;  %vm2153_vm3 = vcmp.ge.f32.partialorder %v2023_v50, 0.0  ;;  %v2185_v52 = vmul.f32 0.1, %v2023_v50  ;;  %v881_v49 = vmul.f32 0.1, %v4149_v32 }
 0x33b   : > { %2279 = vst [vmem:[%s3810_s12 + $0x28] sm:$0xff] %v2247_v47  ;;  %vm2152_vm4 = vcmp.ge.f32.partialorder %v2018_v58, 0.0  ;;  %v2184_v7 = vmul.f32 0.1, %v2018_v58  ;;  %v2771_v46 = vpop.f32.mrb[58].mxu1  ;;  %vm831_vm13 = vcmp.ge.f32.partialorder %v4156_v54, 0.0 }
 0x33c   : > { %2278 = vst [vmem:[%s3810_s12 + $0x20] sm:$0xff] %v2246_v2  ;;  %v2217_v23 = vsel %vm2153_vm3, %v2023_v50, %v2185_v52  ;;  %v2033_v60 = vadd.f32 %v2771_v46, %v3785_v42  ;;  %v2027_v34 = vpop.f32.mrb[59].mxu1  ;;  %v883_v16 = vmul.f32 0.1, %v4150_v35  ;;  %v885_v47 = vmul.f32 0.1, %v4151_v11 }
 0x33d   : > { %v2249_v57 = vadd.f32 %v2217_v23, %v931_v8  ;;  %v2216_v13 = vsel %vm2152_vm4, %v2018_v58, %v2184_v7  ;;  %v2028_v1 = vadd.f32 %v3785_v42, %v2027_v34  ;;  %v945_v37 = vsel %vm817_vm14, %v4149_v32, %v881_v49 }
 0x33e   : > { %v2248_v19 = vadd.f32 %v2216_v13, %v929_v55  ;;  %vm2155_vm7 = vcmp.ge.f32.partialorder %v2033_v60, 0.0  ;;  %v2187_v0 = vmul.f32 0.1, %v2033_v60  ;;  %v887_v7 = vmul.f32 0.1, %v4152_v4 }
 0x33f   : > { %2281 = vst [vmem:[%s3810_s12 + $0x38] sm:$0xff] %v2249_v57  ;;  %vm2154_vm8 = vcmp.ge.f32.partialorder %v2028_v1, 0.0  ;;  %v2186_v25 = vmul.f32 0.1, %v2028_v1  ;;  %v2774_v15 = vpop.f32.mrb[60].mxu1  ;;  %v947_v23 = vsel %vm819_vm1, %v4150_v35, %v883_v16  ;;  %v949_v57 = vsel %vm821_vm2, %v4151_v11, %v885_v47  ;;  %v4158_v16 = vld [vmem:[#allocation28_spill] sm:$0xff] }
 0x340   : > { %2280 = vst [vmem:[%s3810_s12 + $0x30] sm:$0xff] %v2248_v19  ;;  %v2219_v43 = vsel %vm2155_vm7, %v2033_v60, %v2187_v0  ;;  %v2043_v48 = vadd.f32 %v2774_v15, %v3785_v42  ;;  %v2037_v44 = vpop.f32.mrb[61].mxu1  ;;  %v4153_v19 = vld [vmem:[#allocation23_spill] sm:$0xff]  ;;  %v951_v17 = vsel %vm823_vm5, %v4152_v4, %v887_v7  ;;  %vm835_vm1 = vcmp.ge.f32.partialorder %v4158_v16, 0.0  ;;  %v4159_v47 = vld [vmem:[#allocation29_spill] sm:$0xff] }
 0x341   : > { %v2251_v22 = vadd.f32 %v2219_v43, %v935_v51  ;;  %v2218_v6 = vsel %vm2154_vm8, %v2028_v1, %v2186_v25  ;;  %v2038_v41 = vadd.f32 %v3785_v42, %v2037_v44  ;;  %vm825_vm6 = vcmp.ge.f32.partialorder %v4153_v19, 0.0  ;;  %v4160_v4 = vld [vmem:[#allocation31_spill] sm:$0xff] }
 0x342   : > { %v2250_v62 = vadd.f32 %v2218_v6, %v933_v18  ;;  %vm2157_vm11 = vcmp.ge.f32.partialorder %v2043_v48, 0.0  ;;  %v2189_v63 = vmul.f32 0.1, %v2043_v48  ;;  %v889_v25 = vmul.f32 0.1, %v4153_v19 }
 0x343   : > { %2283 = vst [vmem:[%s3810_s12 + $0x48] sm:$0xff] %v2251_v22  ;;  %vm2156_vm12 = vcmp.ge.f32.partialorder %v2038_v41, 0.0  ;;  %v2188_v3 = vmul.f32 0.1, %v2038_v41  ;;  %v2777_v59 = vpop.f32.mrb[62].mxu1  ;;  %vm837_vm2 = vcmp.ge.f32.partialorder %v4159_v47, 0.0 }
 0x344   : > { %2282 = vst [vmem:[%s3810_s12 + $0x40] sm:$0xff] %v2250_v62  ;;  %v2221_v31 = vsel %vm2157_vm11, %v2043_v48, %v2189_v63  ;;  %v2053_v56 = vadd.f32 %v2777_v59, %v3785_v42  ;;  %v2047_v24 = vpop.f32.mrb[63].mxu1  ;;  %v891_v43 = vmul.f32 0.1, %v4154_v38  ;;  %v893_v22 = vmul.f32 0.1, %v4155_v53 }
 0x345   : > { %v2253_v26 = vadd.f32 %v2221_v31, %v939_v27  ;;  %v2220_v61 = vsel %vm2156_vm12, %v2038_v41, %v2188_v3  ;;  %v2048_v40 = vadd.f32 %v3785_v42, %v2047_v24  ;;  %v953_v33 = vsel %vm825_vm6, %v4153_v19, %v889_v25  ;;  %v4161_v25 = vld [vmem:[#allocation35_spill] sm:$0xff] }
 0x346   : > { %v2252_v36 = vadd.f32 %v2220_v61, %v937_v10  ;;  %vm2159_vm15 = vcmp.ge.f32.partialorder %v2053_v56, 0.0  ;;  %v2191_v14 = vmul.f32 0.1, %v2053_v56  ;;  %v895_v3 = vmul.f32 0.1, %v4156_v54 }
 0x347   : > { %2285 = vst [vmem:[%s3810_s12 + $0x58] sm:$0xff] %v2253_v26  ;;  %vm2158_vm0 = vcmp.ge.f32.partialorder %v2048_v40, 0.0  ;;  %v2190_v29 = vmul.f32 0.1, %v2048_v40  ;;  %v2780_v20 = vpop.f32.mrb[64].mxu1  ;;  %v955_v31 = vsel %vm827_vm9, %v4154_v38, %v891_v43  ;;  %v957_v26 = vsel %vm829_vm10, %v4155_v53, %v893_v22  ;;  %v4162_v43 = vld [vmem:[#allocation33_spill] sm:$0xff] }
 0x348   : > { %2284 = vst [vmem:[%s3810_s12 + $0x50] sm:$0xff] %v2252_v36  ;;  %v2223_v50 = vsel %vm2159_vm15, %v2053_v56, %v2191_v14  ;;  %v2063_v45 = vadd.f32 %v2780_v20, %v3785_v42  ;;  %v2057_v9 = vpop.f32.mrb[65].mxu1  ;;  %v4157_v36 = vld [vmem:[#allocation27_spill] sm:$0xff]  ;;  %v959_v49 = vsel %vm831_vm13, %v4156_v54, %v895_v3  ;;  %v903_v7 = vmul.f32 0.1, %v4160_v4 }
 0x349   : > { %v2255_v21 = vadd.f32 %v2223_v50, %v943_v39  ;;  %v2222_v58 = vsel %vm2158_vm0, %v2048_v40, %v2190_v29  ;;  %v2058_v2 = vadd.f32 %v3785_v42, %v2057_v9  ;;  %vm833_vm14 = vcmp.ge.f32.partialorder %v4157_v36, 0.0  ;;  %v4164_v3 = vld [vmem:[#allocation39_spill] sm:$0xff] }
 0x34a   : > { %v2254_v52 = vadd.f32 %v2222_v58, %v941_v28  ;;  %vm2161_vm3 = vcmp.ge.f32.partialorder %v2063_v45, 0.0  ;;  %v2193_v55 = vmul.f32 0.1, %v2063_v45  ;;  %v897_v29 = vmul.f32 0.1, %v4157_v36 }
 0x34b   : > { %2287 = vst [vmem:[%s3810_s12 + $0x68] sm:$0xff] %v2255_v21  ;;  %vm2160_vm4 = vcmp.ge.f32.partialorder %v2058_v2, 0.0  ;;  %v2192_v46 = vmul.f32 0.1, %v2058_v2  ;;  %v2783_v8 = vpop.f32.mrb[66].mxu1  ;;  %vm839_vm5 = vcmp.ge.f32.partialorder %v4160_v4, 0.0 }
 0x34c   : > { %2286 = vst [vmem:[%s3810_s12 + $0x60] sm:$0xff] %v2254_v52  ;;  %v2225_v60 = vsel %vm2161_vm3, %v2063_v45, %v2193_v55  ;;  %v2073_v34 = vadd.f32 %v2783_v8, %v3785_v42  ;;  %v2067_v18 = vpop.f32.mrb[67].mxu1  ;;  %v899_v50 = vmul.f32 0.1, %v4158_v16  ;;  %v901_v52 = vmul.f32 0.1, %v4159_v47 }
 0x34d   : > { %v2257_v13 = vadd.f32 %v2225_v60, %v947_v23  ;;  %v2224_v1 = vsel %vm2160_vm4, %v2058_v2, %v2192_v46  ;;  %v2068_v30 = vadd.f32 %v3785_v42, %v2067_v18  ;;  %vm843_vm9 = vcmp.ge.f32.partialorder %v4161_v25, 0.0 }
 0x34e   : > { %v2256_v0 = vadd.f32 %v2224_v1, %v945_v37  ;;  %vm2163_vm7 = vcmp.ge.f32.partialorder %v2073_v34, 0.0  ;;  %v2195_v51 = vmul.f32 0.1, %v2073_v34  ;;  %v963_v23 = vsel %vm835_vm1, %v4158_v16, %v899_v50  ;;  %v4166_v50 = vld [vmem:[#allocation43_spill] sm:$0xff] }
 0x34f   : > { %2289 = vst [vmem:[%s3810_s12 + $0x78] sm:$0xff] %v2257_v13  ;;  %vm2162_vm8 = vcmp.ge.f32.partialorder %v2068_v30, 0.0  ;;  %v2194_v15 = vmul.f32 0.1, %v2068_v30  ;;  %v2786_v12 = vpop.f32.mrb[68].mxu1  ;;  %v965_v19 = vsel %vm837_vm2, %v4159_v47, %v901_v52  ;;  %vm847_vm13 = vcmp.ge.f32.partialorder %v4164_v3, 0.0 }
 0x350   : > { %2288 = vst [vmem:[%s3810_s12 + $0x70] sm:$0xff] %v2256_v0  ;;  %v2227_v48 = vsel %vm2163_vm7, %v2073_v34, %v2195_v51  ;;  %v2083_v44 = vadd.f32 %v2786_v12, %v3785_v42  ;;  %v2077_v5 = vpop.f32.mrb[69].mxu1  ;;  %v905_v53 = vmul.f32 0.1, %v4162_v43 }
 0x351   : > { %v2259_v6 = vadd.f32 %v2227_v48, %v951_v17  ;;  %v2226_v41 = vsel %vm2162_vm8, %v2068_v30, %v2194_v15  ;;  %v2078_v62 = vadd.f32 %v3785_v42, %v2077_v5  ;;  %v967_v17 = vsel %vm839_vm5, %v4160_v4, %v903_v7 }
 0x352   : > { %v2258_v63 = vadd.f32 %v2226_v41, %v949_v57  ;;  %vm2165_vm11 = vcmp.ge.f32.partialorder %v2083_v44, 0.0  ;;  %v2197_v10 = vmul.f32 0.1, %v2083_v44  ;;  %v961_v57 = vsel %vm833_vm14, %v4157_v36, %v897_v29 }
 0x353   : > { %2291 = vst [vmem:[%s3810_s12 + $0x88] sm:$0xff] %v2259_v6  ;;  %vm2164_vm12 = vcmp.ge.f32.partialorder %v2078_v62, 0.0  ;;  %v2196_v59 = vmul.f32 0.1, %v2078_v62  ;;  %v2789_v27 = vpop.f32.mrb[70].mxu1  ;;  %vm841_vm8 = vcmp.ge.f32.partialorder %v4162_v43, 0.0 }
 0x354   : > { %2290 = vst [vmem:[%s3810_s12 + $0x80] sm:$0xff] %v2258_v63  ;;  %v2229_v56 = vsel %vm2165_vm11, %v2083_v44, %v2197_v10  ;;  %v2093_v24 = vadd.f32 %v2789_v27, %v3785_v42  ;;  %v2087_v28 = vpop.f32.mrb[71].mxu1  ;;  %v907_v15 = vmul.f32 0.1, %v4161_v25 }
 0x355   : > { %v2261_v61 = vadd.f32 %v2229_v56, %v955_v31  ;;  %v2228_v40 = vsel %vm2164_vm12, %v2078_v62, %v2196_v59  ;;  %v2088_v32 = vadd.f32 %v3785_v42, %v2087_v28  ;;  %v4163_v62 = vld [vmem:[#allocation37_spill] sm:$0xff]  ;;  %v911_v59 = vmul.f32 0.1, %v4164_v3 }
 0x356   : > { %v2260_v14 = vadd.f32 %v2228_v40, %v953_v33  ;;  %vm2167_vm15 = vcmp.ge.f32.partialorder %v2093_v24, 0.0  ;;  %v2199_v39 = vmul.f32 0.1, %v2093_v24  ;;  %v909_v63 = vmul.f32 0.1, %v4163_v62 }
 0x357   : > { %2293 = vst [vmem:[%s3810_s12 + $0x98] sm:$0xff] %v2261_v61  ;;  %vm2166_vm0 = vcmp.ge.f32.partialorder %v2088_v32, 0.0  ;;  %v2198_v20 = vmul.f32 0.1, %v2088_v32  ;;  %v2792_v35 = vpop.f32.mrb[72].mxu1  ;;  %v971_v54 = vsel %vm843_vm9, %v4161_v25, %v907_v15  ;;  %vm845_vm12 = vcmp.ge.f32.partialorder %v4163_v62, 0.0 }
 0x358   : > { %2292 = vst [vmem:[%s3810_s12 + $0x90] sm:$0xff] %v2260_v14  ;;  %v2231_v45 = vsel %vm2167_vm15, %v2093_v24, %v2199_v39  ;;  %v2103_v9 = vadd.f32 %v2792_v35, %v3785_v42  ;;  %v2097_v11 = vpop.f32.mrb[73].mxu1  ;;  %v973_v39 = vsel %vm845_vm12, %v4163_v62, %v909_v63  ;;  %v4165_v35 = vld [vmem:[#allocation41_spill] sm:$0xff] }
 0x359   : > { %v2263_v21 = vadd.f32 %v2231_v45, %v959_v49  ;;  %v2230_v58 = vsel %vm2166_vm0, %v2088_v32, %v2198_v20  ;;  %v2098_v2 = vadd.f32 %v3785_v42, %v2097_v11  ;;  %v975_v49 = vsel %vm847_vm13, %v4164_v3, %v911_v59 }
 0x35a   : > { %v2262_v55 = vadd.f32 %v2230_v58, %v957_v26  ;;  %vm2169_vm3 = vcmp.ge.f32.partialorder %v2103_v9, 0.0  ;;  %v2201_v37 = vmul.f32 0.1, %v2103_v9  ;;  %v969_v26 = vsel %vm841_vm8, %v4162_v43, %v905_v53 }
 0x35b   : > { %2295 = vst [vmem:[%s3810_s12 + $0xa8] sm:$0xff] %v2263_v21  ;;  %vm2168_vm4 = vcmp.ge.f32.partialorder %v2098_v2, 0.0  ;;  %v2200_v46 = vmul.f32 0.1, %v2098_v2  ;;  %v2795_v8 = vpop.f32.mrb[74].mxu1  ;;  %vm851_vm0 = vcmp.ge.f32.partialorder %v4166_v50, 0.0 }
 0x35c   : > { %2294 = vst [vmem:[%s3810_s12 + $0xa0] sm:$0xff] %v2262_v55  ;;  %v2233_v60 = vsel %vm2169_vm3, %v2103_v9, %v2201_v37  ;;  %v2113_v34 = vadd.f32 %v2795_v8, %v3785_v42  ;;  %v2107_v18 = vpop.f32.mrb[75].mxu1  ;;  %v913_v16 = vmul.f32 0.1, %v4165_v35  ;;  %v915_v45 = vmul.f32 0.1, %v4166_v50 }
 0x35d   : > { %v2265_v13 = vadd.f32 %v2233_v60, %v963_v23  ;;  %v2232_v1 = vsel %vm2168_vm4, %v2098_v2, %v2200_v46  ;;  %v2108_v30 = vadd.f32 %v3785_v42, %v2107_v18  ;;  %vm849_vm1 = vcmp.ge.f32.partialorder %v4165_v35, 0.0 }
 0x35e   : > { %v2264_v0 = vadd.f32 %v2232_v1, %v961_v57  ;;  %vm2171_vm6 = vcmp.ge.f32.partialorder %v2113_v34, 0.0  ;;  %v2203_v51 = vmul.f32 0.1, %v2113_v34  ;;  %v979_v4 = vsel %vm851_vm0, %v4166_v50, %v915_v45 }
 0x35f   : > { %2297 = vst [vmem:[%s3810_s12 + $0xb8] sm:$0xff] %v2265_v13  ;;  %vm2170_vm7 = vcmp.ge.f32.partialorder %v2108_v30, 0.0  ;;  %v2202_v12 = vmul.f32 0.1, %v2108_v30  ;;  %v2798_v38 = vpop.f32.mrb[76].mxu1 }
 0x360   : > { %2296 = vst [vmem:[%s3810_s12 + $0xb0] sm:$0xff] %v2264_v0  ;;  %v2235_v48 = vsel %vm2171_vm6, %v2113_v34, %v2203_v51  ;;  %v2123_v44 = vadd.f32 %v2798_v38, %v3785_v42  ;;  %v2117_v5 = vpop.f32.mrb[77].mxu1 }
 0x361   : > { %v2267_v22 = vadd.f32 %v2235_v48, %v967_v17  ;;  %v2234_v6 = vsel %vm2170_vm7, %v2108_v30, %v2202_v12  ;;  %v2118_v41 = vadd.f32 %v3785_v42, %v2117_v5 }
 0x362   : > { %v2266_v10 = vadd.f32 %v2234_v6, %v965_v19  ;;  %vm2173_vm10 = vcmp.ge.f32.partialorder %v2123_v44, 0.0  ;;  %v2205_v33 = vmul.f32 0.1, %v2123_v44 }
 0x363   : > { %2299 = vst [vmem:[%s3810_s12 + $0xc8] sm:$0xff] %v2267_v22  ;;  %vm2172_vm11 = vcmp.ge.f32.partialorder %v2118_v41, 0.0  ;;  %v2204_v27 = vmul.f32 0.1, %v2118_v41  ;;  %v2801_v31 = vpop.f32.mrb[78].mxu1 }
 0x364   : > { %2298 = vst [vmem:[%s3810_s12 + $0xc0] sm:$0xff] %v2266_v10  ;;  %v2237_v56 = vsel %vm2173_vm10, %v2123_v44, %v2205_v33  ;;  %v2133_v24 = vadd.f32 %v2801_v31, %v3785_v42  ;;  %v2127_v28 = vpop.f32.mrb[79].mxu1 }
 0x365   : > { %v2269_v61 = vadd.f32 %v2237_v56, %v971_v54  ;;  %v2236_v40 = vsel %vm2172_vm11, %v2118_v41, %v2204_v27  ;;  %v2128_v32 = vadd.f32 %v3785_v42, %v2127_v28 }
 0x366   : > { %v2268_v36 = vadd.f32 %v2236_v40, %v969_v26  ;;  %vm2175_vm14 = vcmp.ge.f32.partialorder %v2133_v24, 0.0  ;;  %v2207_v14 = vmul.f32 0.1, %v2133_v24 }
 0x367   : > { %2301 = vst [vmem:[%s3810_s12 + $0xd8] sm:$0xff] %v2269_v61  ;;  %vm2174_vm15 = vcmp.ge.f32.partialorder %v2128_v32, 0.0  ;;  %v2206_v29 = vmul.f32 0.1, %v2128_v32  ;;  %v2804_v20 = vpop.f32.mrb[80].mxu1 }
 0x368   : > { %2300 = vst [vmem:[%s3810_s12 + $0xd0] sm:$0xff] %v2268_v36  ;;  %v2239_v9 = vsel %vm2175_vm14, %v2133_v24, %v2207_v14  ;;  %v2143_v11 = vadd.f32 %v2804_v20, %v3785_v42  ;;  %v2137_v47 = vpop.f32.mrb[81].mxu1 }
 0x369   : > { %v2271_v21 = vadd.f32 %v2239_v9, %v975_v49  ;;  %v2238_v58 = vsel %vm2174_vm15, %v2128_v32, %v2206_v29  ;;  %v2138_v2 = vadd.f32 %v3785_v42, %v2137_v47  ;;  %v977_v42 = vsel %vm849_vm1, %v4165_v35, %v913_v16 }
 0x36a   : > { %v2270_v52 = vadd.f32 %v2238_v58, %v973_v39  ;;  %vm2177_vm2 = vcmp.ge.f32.partialorder %v2143_v11, 0.0  ;;  %v2209_v55 = vmul.f32 0.1, %v2143_v11 }
 0x36b   : > { %2303 = vst [vmem:[%s3810_s12 + $0xe8] sm:$0xff] %v2271_v21  ;;  %vm2176_vm3 = vcmp.ge.f32.partialorder %v2138_v2, 0.0  ;;  %v2208_v37 = vmul.f32 0.1, %v2138_v2 }
 0x36c   : > { %2302 = vst [vmem:[%s3810_s12 + $0xe0] sm:$0xff] %v2270_v52  ;;  %v2241_v7 = vsel %vm2177_vm2, %v2143_v11, %v2209_v55 }
 0x36d   : > { %v2273_v46 = vadd.f32 %v2241_v7, %v979_v4  ;;  %v2240_v8 = vsel %vm2176_vm3, %v2138_v2, %v2208_v37 }
 0x36e   : > { %v2272_v23 = vadd.f32 %v2240_v8, %v977_v42 }
 0x36f   : > { %2305 = vst [vmem:[%s3810_s12 + $0xf8] sm:$0xff] %v2273_v46 }
 0x370   : > { %2304 = vst [vmem:[%s3810_s12 + $0xf0] sm:$0xff] %v2272_v23 }
 0x371   : > { %2906 = shalt.err (!%p2903_p3)
}
 0x372   : > { %s2907_s29 = scalar_lea.hbm %s3993_s26, 4096  ;;  %s2911_s21 = scalar_lea.hbm %s4052_s10, 12288 }
 0x373   : > { %p2908_p4 = scmp.ne.s32.totalorder %s3993_s26, %s2907_s29  ;;  %p2912_p9 = scmp.lt.u32.totalorder %s3993_s26, %s4052_s10 }
 0x374   : > { %p2913_p10 = scmp.lt.u32.totalorder %s2911_s21, %s2907_s29  ;;  %p2915_p12 = scmp.lt.u32.totalorder %s2907_s29, %s3993_s26 }
 0x375   : > { %p2909_p7 = pnand %p2908_p4, %p3054_p5 }
 0x376   : > { %p2914_p11 = por %p2913_p10, %p2912_p9 }
 0x377   : > { %p2910_p8 = pneg %p2909_p7 }
 0x378   : > { %p2916_p13 = por %p2915_p12, %p2914_p11 }
 0x37a   : > { %p2917_p0 = pnand %p2916_p13, %p2910_p8 }
 0x37c   : > { %2920 = shalt.err (!%p2917_p0)
}
 0x37d   : > { %s2959_s11 = smov 128   ;;  %s2960_s28 = smov 8  }
 0x37e   : > { %2851 = dma.vmem_to_hbm [thread:$0]  (%p3054_p5), %s3995_s20, 4096, %s3993_s26, %s4001_s17, %s2959_s11, %s2959_s11, %s2960_s28  }
 0x37f PF: > { %p2857_p1 = scmp.ge.s32.totalorder %s2955_s16, 2  ;;  %s2335_s30 = sand.u32 1, %s2943_s13  }
 0x380   : > { %s2336_s29 = scalar_lea.sflag [#allocation3], %s2335_s30 }
 0x381   : > { %p2854_p2 = pnand %p2857_p1, %p3058_p6 }
 0x383   : > { %2938 = dma.done.wait (!%p2854_p2), %s2336_s29, 4096  }
 0x384   : > { %2940 = vsyncadd (!%p2854_p2), %s2336_s29, 4294963200  ;;  %p20_p3 = scmp.ge.s32.totalorder %s3041_s19, 5   ;;  %s4167_s13 = smov %s2947_s14 }
 0x385   : > { %s4168_s14 = smov %s2951_s15  ;;  %s4169_s15 = smov %s3052_s22 }
 0x386   : > { %s4170_s16 = smov %s3041_s19  ;;  %22 = sbr.rel (!%p20_p3) target bundleno = 3 (0x3), region = 98 }
 0x38d   :  { %2341 = vsyncpa [#allocation3], 1 }
 0x38e   :  { %2343 = vsyncpa [#allocation3 + $0x1], 1 }

</bundles_post_ra>
